<compile_context>
chip_gen: v7x
topology: tpu7x:2x2x1
jax: 0.10.0
libtpu: 0.0.40
codegen_flags: <defaults>
</compile_context>

<pallas_src>
import functools
import math

import jax
import jax.numpy as jnp
from jax.experimental import pallas as pl
from jax.experimental.pallas import tpu as pltpu


def _layer_norm(v, g, b, eps=1e-5):
    mu = jnp.mean(v, axis=-1, keepdims=True)
    var = jnp.mean((v - mu) ** 2, axis=-1, keepdims=True)
    return (v - mu) * jax.lax.rsqrt(var + eps) * g + b


def _encoder_kernel(x_ref, wqkv_ref, bqkv_ref, wo_ref, bo_ref,
                    ln1g_ref, ln1b_ref, w1_ref, b1_ref, w2_ref, b2_ref,
                    ln2g_ref, ln2b_ref, fg_ref, fb_ref, o_ref,
                    *, num_layers, num_heads, batch, seq):
    d_model = x_ref.shape[-1]
    dk = d_model // num_heads
    scale = 1.0 / math.sqrt(dk)

    x = x_ref[...].astype(jnp.float32)                 # (B*S, D), rows = batch*seq

    def to_heads(m):
        # (B*S, H*dk) -> (H*B, S, dk): lane slice per head + tile-aligned
        # leading-dim reshape + leading-dim concat (no cross-lane transposes).
        return jnp.concatenate(
            [m[:, h * dk:(h + 1) * dk].reshape(batch, seq, dk)
             for h in range(num_heads)],
            axis=0)

    for l in range(num_layers):                        # static unroll, N small
        # ---------- fused QKV projection: one wide MXU matmul ----------
        qkv = jnp.dot(x, wqkv_ref[l],
                      preferred_element_type=jnp.float32) + bqkv_ref[l]
        q = qkv[:, :d_model]
        k = qkv[:, d_model:2 * d_model]
        v = qkv[:, 2 * d_model:]

        qg = to_heads(q)                               # (H*B, S, dk)
        kg = to_heads(k)
        vg = to_heads(v)

        # ---------- batched scaled-dot-product attention ----------
        s = jnp.einsum('gsd,gtd->gst', qg, kg,
                       preferred_element_type=jnp.float32) * scale
        # TODO(synk): attention mask not applied (mask=None path only).
        s = s - jnp.max(s, axis=-1, keepdims=True)
        p = jnp.exp(s)
        p = p * pl.reciprocal(jnp.sum(p, axis=-1, keepdims=True), approx=True)
        og = jnp.einsum('gst,gtd->gsd', p, vg,
                        preferred_element_type=jnp.float32)   # (H*B, S, dk)

        # heads back onto the lane axis -> (B*S, D)
        attn = jnp.concatenate(
            [og[h * batch:(h + 1) * batch] for h in range(num_heads)],
            axis=-1).reshape(batch * seq, d_model)

        attn = jnp.dot(attn, wo_ref[l],
                       preferred_element_type=jnp.float32) + bo_ref[l]
        y = _layer_norm(x + attn, ln1g_ref[l], ln1b_ref[l])    # Add & Norm 1

        # ---------- feed-forward ----------
        f = jnp.dot(y, w1_ref[l], preferred_element_type=jnp.float32) + b1_ref[l]
        f = jnp.maximum(f, 0.0)                                # ReLU
        f = jnp.dot(f, w2_ref[l], preferred_element_type=jnp.float32) + b2_ref[l]
        x = _layer_norm(y + f, ln2g_ref[l], ln2b_ref[l])       # Add & Norm 2

    # ---------- final Encoder LayerNorm, single flattened store ----------
    o_ref[...] = _layer_norm(x, fg_ref[...], fb_ref[...]).astype(o_ref.dtype)


def pack_encoder_params(layers, final_g, final_b):
    """Fuse Q|K|V weights/biases and stack all per-layer params on a leading
    layer axis so the whole stack is passed to a single pallas_call."""
    wqkv = jnp.stack([jnp.concatenate([p['wq'], p['wk'], p['wv']], axis=1)
                      for p in layers])                        # (N, D, 3D)
    bqkv = jnp.stack([jnp.concatenate([p['bq'], p['bk'], p['bv']], axis=1)
                      for p in layers])                        # (N, 1, 3D)

    def st(name):
        return jnp.stack([p[name] for p in layers])

    return (wqkv, bqkv, st('wo'), st('bo'), st('ln1g'), st('ln1b'),
            st('w1'), st('b1'), st('w2'), st('b2'), st('ln2g'), st('ln2b'),
            final_g, final_b)


def encoder_forward(src, layers, final_g, final_b, num_heads):
    """Full Encoder forward in ONE Pallas kernel (all layers + final LN)."""
    B, S, D = src.shape
    N = len(layers)
    params = pack_encoder_params(layers, final_g, final_b)

    x_flat = src.reshape(B * S, D)                     # batch collapsed
    args = (x_flat,) + params

    vmem_specs = [pl.BlockSpec(memory_space=pltpu.MemorySpace.VMEM)
                  for _ in args]

    out_flat = pl.pallas_call(
        functools.partial(_encoder_kernel, num_layers=N, num_heads=num_heads,
                          batch=B, seq=S),
        out_shape=jax.ShapeDtypeStruct((B * S, D), src.dtype),
        in_specs=vmem_specs,
        out_specs=pl.BlockSpec(memory_space=pltpu.MemorySpace.VMEM),
    )(*args)
    return out_flat.reshape(B, S, D)


def init_encoder_params(key, N, d_model, d_in, d_hid):
    """Deterministic synthetic parameters (weights ~ N(0, 0.02), LN gamma=1, beta=0).
    Weight layout is (in_features, out_features): y = x @ W + b."""
    layers = []
    for _ in range(N):
        ks = jax.random.split(key, 7)
        key = ks[0]
        p = {
            'wq': jax.random.normal(ks[1], (d_model, d_model), jnp.float32) * 0.02,
            'bq': jnp.zeros((1, d_model), jnp.float32),
            'wk': jax.random.normal(ks[2], (d_model, d_model), jnp.float32) * 0.02,
            'bk': jnp.zeros((1, d_model), jnp.float32),
            'wv': jax.random.normal(ks[3], (d_model, d_model), jnp.float32) * 0.02,
            'bv': jnp.zeros((1, d_model), jnp.float32),
            'wo': jax.random.normal(ks[4], (d_model, d_model), jnp.float32) * 0.02,
            'bo': jnp.zeros((1, d_model), jnp.float32),
            'ln1g': jnp.ones((1, d_model), jnp.float32),
            'ln1b': jnp.zeros((1, d_model), jnp.float32),
            'w1': jax.random.normal(ks[5], (d_in, d_hid), jnp.float32) * 0.02,
            'b1': jnp.zeros((1, d_hid), jnp.float32),
            'w2': jax.random.normal(ks[6], (d_hid, d_in), jnp.float32) * 0.02,
            'b2': jnp.zeros((1, d_in), jnp.float32),
            'ln2g': jnp.ones((1, d_model), jnp.float32),
            'ln2b': jnp.zeros((1, d_model), jnp.float32),
        }
        layers.append(p)
    final_g = jnp.ones((1, d_model), jnp.float32)
    final_b = jnp.zeros((1, d_model), jnp.float32)
    return layers, final_g, final_b


def encoder_reference(src, layers, final_g, final_b, num_heads, eps=1e-5):
    """Pure-JAX reference of the same forward pass (for a sanity check)."""
    def ln(v, g, b):
        mu = v.mean(-1, keepdims=True)
        var = ((v - mu) ** 2).mean(-1, keepdims=True)
        return (v - mu) / jnp.sqrt(var + eps) * g + b

    B, S, D = src.shape
    H = num_heads
    dk = D // H
    x = src
    for p in layers:
        q = x @ p['wq'] + p['bq']
        k = x @ p['wk'] + p['bk']
        v = x @ p['wv'] + p['bv']
        qh = q.reshape(B, S, H, dk).transpose(0, 2, 1, 3)
        kh = k.reshape(B, S, H, dk).transpose(0, 2, 1, 3)
        vh = v.reshape(B, S, H, dk).transpose(0, 2, 1, 3)
        s = jnp.einsum('bhsd,bhtd->bhst', qh, kh) / math.sqrt(dk)
        a = jax.nn.softmax(s, axis=-1)
        o = jnp.einsum('bhst,bhtd->bhsd', a, vh).transpose(0, 2, 1, 3)
        o = o.reshape(B, S, D) @ p['wo'] + p['bo']
        y = ln(x + o, p['ln1g'], p['ln1b'])
        f = jnp.maximum(y @ p['w1'] + p['b1'], 0.0) @ p['w2'] + p['b2']
        x = ln(y + f, p['ln2g'], p['ln2b'])
    return ln(x, final_g, final_b)


if __name__ == "__main__":
    # Small shapes consistent with the module: N=2 layers, d_model=d_in=32,
    # num_heads=4, d_hid=64, batch=2, seq=8.
    N, d_model, num_heads, d_in, d_hid = 2, 32, 4, 32, 64
    B, S = 2, 8

    key = jax.random.PRNGKey(0)
    k_src, k_params = jax.random.split(key)
    src = jax.random.normal(k_src, (B, S, d_model), jnp.float32)

    layers, final_g, final_b = init_encoder_params(k_params, N, d_model, d_in, d_hid)

    out = encoder_forward(src, layers, final_g, final_b, num_heads)
    out = jax.block_until_ready(out)
    assert out.shape == (B, S, d_model), out.shape

    ref = encoder_reference(src, layers, final_g, final_b, num_heads)
    max_err = float(jnp.max(jnp.abs(out - ref)))
    assert jnp.allclose(out, ref, atol=2e-2, rtol=2e-2), max_err

    print("KERNEL_OK")
</pallas_src>

<mosaic_0001>
module attributes {stable_mosaic.version = 11 : i64} {
  func.func @_encoder_kernel(%arg0: memref<16x32xf32, #tpu.memory_space<vmem>>, %arg1: memref<2x32x96xf32, #tpu.memory_space<vmem>>, %arg2: memref<2x1x96xf32, #tpu.memory_space<vmem>>, %arg3: memref<2x32x32xf32, #tpu.memory_space<vmem>>, %arg4: memref<2x1x32xf32, #tpu.memory_space<vmem>>, %arg5: memref<2x1x32xf32, #tpu.memory_space<vmem>>, %arg6: memref<2x1x32xf32, #tpu.memory_space<vmem>>, %arg7: memref<2x32x64xf32, #tpu.memory_space<vmem>>, %arg8: memref<2x1x64xf32, #tpu.memory_space<vmem>>, %arg9: memref<2x64x32xf32, #tpu.memory_space<vmem>>, %arg10: memref<2x1x32xf32, #tpu.memory_space<vmem>>, %arg11: memref<2x1x32xf32, #tpu.memory_space<vmem>>, %arg12: memref<2x1x32xf32, #tpu.memory_space<vmem>>, %arg13: memref<1x32xf32, #tpu.memory_space<vmem>>, %arg14: memref<1x32xf32, #tpu.memory_space<vmem>>, %arg15: memref<16x32xf32, #tpu.memory_space<vmem>>) attributes {dimension_semantics = [], scalar_prefetch = 0 : i64, scratch_operands = 0 : i64, tpu.core_type = #tpu.core_type<tc>} {
    %c0 = arith.constant 0 : index
    %c0_0 = arith.constant 0 : index
    %0 = vector.load %arg0[%c0, %c0_0] : memref<16x32xf32, #tpu.memory_space<vmem>>, vector<16x32xf32>
    %c0_1 = arith.constant 0 : index
    %c0_2 = arith.constant 0 : index
    %c0_3 = arith.constant 0 : index
    %1 = vector.load %arg1[%c0_1, %c0_2, %c0_3] : memref<2x32x96xf32, #tpu.memory_space<vmem>>, vector<1x32x96xf32>
    %2 = vector.shape_cast %1 : vector<1x32x96xf32> to vector<32x96xf32>
    %cst = arith.constant dense<0.000000e+00> : vector<16x96xf32>
    %3 = tpu.matmul %0, %2, %cst {dimension_numbers = #tpu.dot_dimension_numbers<[1], [0], [0], [1], [0, 0, 1, 1], [], []>} : vector<16x32xf32>, vector<32x96xf32>, vector<16x96xf32> -> vector<16x96xf32>
    %c0_4 = arith.constant 0 : index
    %c0_5 = arith.constant 0 : index
    %c0_6 = arith.constant 0 : index
    %4 = vector.load %arg2[%c0_4, %c0_5, %c0_6] : memref<2x1x96xf32, #tpu.memory_space<vmem>>, vector<1x1x96xf32>
    %5 = vector.shape_cast %4 : vector<1x1x96xf32> to vector<1x96xf32>
    %6 = vector.broadcast %5 : vector<1x96xf32> to vector<16x96xf32>
    %7 = arith.addf %3, %6 : vector<16x96xf32>
    %8 = vector.extract_strided_slice %7 {offsets = [0, 0], sizes = [16, 32], strides = [1, 1]} : vector<16x96xf32> to vector<16x32xf32>
    %9 = vector.extract_strided_slice %7 {offsets = [0, 32], sizes = [16, 32], strides = [1, 1]} : vector<16x96xf32> to vector<16x32xf32>
    %10 = vector.extract_strided_slice %7 {offsets = [0, 64], sizes = [16, 32], strides = [1, 1]} : vector<16x96xf32> to vector<16x32xf32>
    %11 = vector.extract_strided_slice %8 {offsets = [0, 0], sizes = [16, 8], strides = [1, 1]} : vector<16x32xf32> to vector<16x8xf32>
    %12 = vector.shape_cast %11 : vector<16x8xf32> to vector<2x8x8xf32>
    %13 = vector.extract_strided_slice %8 {offsets = [0, 8], sizes = [16, 8], strides = [1, 1]} : vector<16x32xf32> to vector<16x8xf32>
    %14 = vector.shape_cast %13 : vector<16x8xf32> to vector<2x8x8xf32>
    %15 = vector.extract_strided_slice %8 {offsets = [0, 16], sizes = [16, 8], strides = [1, 1]} : vector<16x32xf32> to vector<16x8xf32>
    %16 = vector.shape_cast %15 : vector<16x8xf32> to vector<2x8x8xf32>
    %17 = vector.extract_strided_slice %8 {offsets = [0, 24], sizes = [16, 8], strides = [1, 1]} : vector<16x32xf32> to vector<16x8xf32>
    %18 = vector.shape_cast %17 : vector<16x8xf32> to vector<2x8x8xf32>
    %19 = tpu.concatenate %12, %14, %16, %18 in 0 : vector<2x8x8xf32>, vector<2x8x8xf32>, vector<2x8x8xf32>, vector<2x8x8xf32> -> vector<8x8x8xf32>
    %20 = vector.extract_strided_slice %9 {offsets = [0, 0], sizes = [16, 8], strides = [1, 1]} : vector<16x32xf32> to vector<16x8xf32>
    %21 = vector.shape_cast %20 : vector<16x8xf32> to vector<2x8x8xf32>
    %22 = vector.extract_strided_slice %9 {offsets = [0, 8], sizes = [16, 8], strides = [1, 1]} : vector<16x32xf32> to vector<16x8xf32>
    %23 = vector.shape_cast %22 : vector<16x8xf32> to vector<2x8x8xf32>
    %24 = vector.extract_strided_slice %9 {offsets = [0, 16], sizes = [16, 8], strides = [1, 1]} : vector<16x32xf32> to vector<16x8xf32>
    %25 = vector.shape_cast %24 : vector<16x8xf32> to vector<2x8x8xf32>
    %26 = vector.extract_strided_slice %9 {offsets = [0, 24], sizes = [16, 8], strides = [1, 1]} : vector<16x32xf32> to vector<16x8xf32>
    %27 = vector.shape_cast %26 : vector<16x8xf32> to vector<2x8x8xf32>
    %28 = tpu.concatenate %21, %23, %25, %27 in 0 : vector<2x8x8xf32>, vector<2x8x8xf32>, vector<2x8x8xf32>, vector<2x8x8xf32> -> vector<8x8x8xf32>
    %29 = vector.extract_strided_slice %10 {offsets = [0, 0], sizes = [16, 8], strides = [1, 1]} : vector<16x32xf32> to vector<16x8xf32>
    %30 = vector.shape_cast %29 : vector<16x8xf32> to vector<2x8x8xf32>
    %31 = vector.extract_strided_slice %10 {offsets = [0, 8], sizes = [16, 8], strides = [1, 1]} : vector<16x32xf32> to vector<16x8xf32>
    %32 = vector.shape_cast %31 : vector<16x8xf32> to vector<2x8x8xf32>
    %33 = vector.extract_strided_slice %10 {offsets = [0, 16], sizes = [16, 8], strides = [1, 1]} : vector<16x32xf32> to vector<16x8xf32>
    %34 = vector.shape_cast %33 : vector<16x8xf32> to vector<2x8x8xf32>
    %35 = vector.extract_strided_slice %10 {offsets = [0, 24], sizes = [16, 8], strides = [1, 1]} : vector<16x32xf32> to vector<16x8xf32>
    %36 = vector.shape_cast %35 : vector<16x8xf32> to vector<2x8x8xf32>
    %37 = tpu.concatenate %30, %32, %34, %36 in 0 : vector<2x8x8xf32>, vector<2x8x8xf32>, vector<2x8x8xf32>, vector<2x8x8xf32> -> vector<8x8x8xf32>
    "tpu.trace_start"() <{level = 10 : i32, message = "gsd,gtd->gst"}> : () -> ()
    %cst_7 = arith.constant dense<0.000000e+00> : vector<8x8x8xf32>
    %38 = tpu.matmul %19, %28, %cst_7 {dimension_numbers = #tpu.dot_dimension_numbers<[2], [2], [1], [1], [0, 0, 0, 1, 1, 1], [0], [0]>} : vector<8x8x8xf32>, vector<8x8x8xf32>, vector<8x8x8xf32> -> vector<8x8x8xf32>
    "tpu.trace_stop"() : () -> ()
    %cst_8 = arith.constant 0.353553385 : f32
    %39 = vector.broadcast %cst_8 : f32 to vector<8x8x8xf32>
    %40 = arith.mulf %38, %39 : vector<8x8x8xf32>
    %cst_9 = arith.constant dense<0xFF800000> : vector<8x8xf32>
    %41 = vector.multi_reduction <maximumf>, %40, %cst_9 [2] : vector<8x8x8xf32> to vector<8x8xf32>
    %42 = vector.shape_cast %41 : vector<8x8xf32> to vector<8x8x1xf32>
    %43 = vector.broadcast %42 : vector<8x8x1xf32> to vector<8x8x8xf32>
    %44 = arith.subf %40, %43 : vector<8x8x8xf32>
    %45 = math.exp %44 : vector<8x8x8xf32>
    %cst_10 = arith.constant dense<0.000000e+00> : vector<8x8xf32>
    %46 = vector.multi_reduction <add>, %45, %cst_10 [2] : vector<8x8x8xf32> to vector<8x8xf32>
    %47 = vector.shape_cast %46 : vector<8x8xf32> to vector<8x8x1xf32>
    %48 = tpu.reciprocal %47 {approx = true} : vector<8x8x1xf32> -> vector<8x8x1xf32>
    %49 = vector.broadcast %48 : vector<8x8x1xf32> to vector<8x8x8xf32>
    %50 = arith.mulf %45, %49 : vector<8x8x8xf32>
    "tpu.trace_start"() <{level = 10 : i32, message = "gst,gtd->gsd"}> : () -> ()
    %cst_11 = arith.constant dense<0.000000e+00> : vector<8x8x8xf32>
    %51 = tpu.matmul %50, %37, %cst_11 {dimension_numbers = #tpu.dot_dimension_numbers<[2], [1], [1], [2], [0, 0, 0, 1, 1, 2], [0], [0]>} : vector<8x8x8xf32>, vector<8x8x8xf32>, vector<8x8x8xf32> -> vector<8x8x8xf32>
    "tpu.trace_stop"() : () -> ()
    %52 = vector.extract_strided_slice %51 {offsets = [0, 0, 0], sizes = [2, 8, 8], strides = [1, 1, 1]} : vector<8x8x8xf32> to vector<2x8x8xf32>
    %53 = vector.extract_strided_slice %51 {offsets = [2, 0, 0], sizes = [2, 8, 8], strides = [1, 1, 1]} : vector<8x8x8xf32> to vector<2x8x8xf32>
    %54 = vector.extract_strided_slice %51 {offsets = [4, 0, 0], sizes = [2, 8, 8], strides = [1, 1, 1]} : vector<8x8x8xf32> to vector<2x8x8xf32>
    %55 = vector.extract_strided_slice %51 {offsets = [6, 0, 0], sizes = [2, 8, 8], strides = [1, 1, 1]} : vector<8x8x8xf32> to vector<2x8x8xf32>
    %56 = tpu.concatenate %52, %53, %54, %55 in 2 : vector<2x8x8xf32>, vector<2x8x8xf32>, vector<2x8x8xf32>, vector<2x8x8xf32> -> vector<2x8x32xf32>
    %57 = vector.shape_cast %56 : vector<2x8x32xf32> to vector<16x32xf32>
    %c0_12 = arith.constant 0 : index
    %c0_13 = arith.constant 0 : index
    %c0_14 = arith.constant 0 : index
    %58 = vector.load %arg3[%c0_12, %c0_13, %c0_14] : memref<2x32x32xf32, #tpu.memory_space<vmem>>, vector<1x32x32xf32>
    %59 = vector.shape_cast %58 : vector<1x32x32xf32> to vector<32x32xf32>
    %cst_15 = arith.constant dense<0.000000e+00> : vector<16x32xf32>
    %60 = tpu.matmul %57, %59, %cst_15 {dimension_numbers = #tpu.dot_dimension_numbers<[1], [0], [0], [1], [0, 0, 1, 1], [], []>} : vector<16x32xf32>, vector<32x32xf32>, vector<16x32xf32> -> vector<16x32xf32>
    %c0_16 = arith.constant 0 : index
    %c0_17 = arith.constant 0 : index
    %c0_18 = arith.constant 0 : index
    %61 = vector.load %arg4[%c0_16, %c0_17, %c0_18] : memref<2x1x32xf32, #tpu.memory_space<vmem>>, vector<1x1x32xf32>
    %62 = vector.shape_cast %61 : vector<1x1x32xf32> to vector<1x32xf32>
    %63 = vector.broadcast %62 : vector<1x32xf32> to vector<16x32xf32>
    %64 = arith.addf %60, %63 : vector<16x32xf32>
    %65 = arith.addf %0, %64 : vector<16x32xf32>
    %c0_19 = arith.constant 0 : index
    %c0_20 = arith.constant 0 : index
    %c0_21 = arith.constant 0 : index
    %66 = vector.load %arg5[%c0_19, %c0_20, %c0_21] : memref<2x1x32xf32, #tpu.memory_space<vmem>>, vector<1x1x32xf32>
    %67 = vector.shape_cast %66 : vector<1x1x32xf32> to vector<1x32xf32>
    %c0_22 = arith.constant 0 : index
    %c0_23 = arith.constant 0 : index
    %c0_24 = arith.constant 0 : index
    %68 = vector.load %arg6[%c0_22, %c0_23, %c0_24] : memref<2x1x32xf32, #tpu.memory_space<vmem>>, vector<1x1x32xf32>
    %69 = vector.shape_cast %68 : vector<1x1x32xf32> to vector<1x32xf32>
    %cst_25 = arith.constant dense<0.000000e+00> : vector<16xf32>
    %70 = vector.multi_reduction <add>, %65, %cst_25 [1] : vector<16x32xf32> to vector<16xf32>
    %71 = vector.shape_cast %70 : vector<16xf32> to vector<16x1xf32>
    %cst_26 = arith.constant 3.200000e+01 : f32
    %72 = vector.broadcast %cst_26 : f32 to vector<16x1xf32>
    %73 = arith.divf %71, %72 : vector<16x1xf32>
    %74 = vector.broadcast %73 : vector<16x1xf32> to vector<16x32xf32>
    %75 = arith.subf %65, %74 : vector<16x32xf32>
    %76 = arith.mulf %75, %75 : vector<16x32xf32>
    %cst_27 = arith.constant dense<0.000000e+00> : vector<16xf32>
    %77 = vector.multi_reduction <add>, %76, %cst_27 [1] : vector<16x32xf32> to vector<16xf32>
    %78 = vector.shape_cast %77 : vector<16xf32> to vector<16x1xf32>
    %cst_28 = arith.constant 3.200000e+01 : f32
    %79 = vector.broadcast %cst_28 : f32 to vector<16x1xf32>
    %80 = arith.divf %78, %79 : vector<16x1xf32>
    %81 = vector.broadcast %73 : vector<16x1xf32> to vector<16x32xf32>
    %82 = arith.subf %65, %81 : vector<16x32xf32>
    %cst_29 = arith.constant 9.99999974E-6 : f32
    %83 = vector.broadcast %cst_29 : f32 to vector<16x1xf32>
    %84 = arith.addf %80, %83 : vector<16x1xf32>
    %85 = math.rsqrt %84 : vector<16x1xf32>
    %86 = vector.broadcast %85 : vector<16x1xf32> to vector<16x32xf32>
    %87 = arith.mulf %82, %86 : vector<16x32xf32>
    %88 = vector.broadcast %67 : vector<1x32xf32> to vector<16x32xf32>
    %89 = arith.mulf %87, %88 : vector<16x32xf32>
    %90 = vector.broadcast %69 : vector<1x32xf32> to vector<16x32xf32>
    %91 = arith.addf %89, %90 : vector<16x32xf32>
    %c0_30 = arith.constant 0 : index
    %c0_31 = arith.constant 0 : index
    %c0_32 = arith.constant 0 : index
    %92 = vector.load %arg7[%c0_30, %c0_31, %c0_32] : memref<2x32x64xf32, #tpu.memory_space<vmem>>, vector<1x32x64xf32>
    %93 = vector.shape_cast %92 : vector<1x32x64xf32> to vector<32x64xf32>
    %cst_33 = arith.constant dense<0.000000e+00> : vector<16x64xf32>
    %94 = tpu.matmul %91, %93, %cst_33 {dimension_numbers = #tpu.dot_dimension_numbers<[1], [0], [0], [1], [0, 0, 1, 1], [], []>} : vector<16x32xf32>, vector<32x64xf32>, vector<16x64xf32> -> vector<16x64xf32>
    %c0_34 = arith.constant 0 : index
    %c0_35 = arith.constant 0 : index
    %c0_36 = arith.constant 0 : index
    %95 = vector.load %arg8[%c0_34, %c0_35, %c0_36] : memref<2x1x64xf32, #tpu.memory_space<vmem>>, vector<1x1x64xf32>
    %96 = vector.shape_cast %95 : vector<1x1x64xf32> to vector<1x64xf32>
    %97 = vector.broadcast %96 : vector<1x64xf32> to vector<16x64xf32>
    %98 = arith.addf %94, %97 : vector<16x64xf32>
    %cst_37 = arith.constant 0.000000e+00 : f32
    %99 = vector.broadcast %cst_37 : f32 to vector<16x64xf32>
    %100 = arith.maximumf %98, %99 : vector<16x64xf32>
    %c0_38 = arith.constant 0 : index
    %c0_39 = arith.constant 0 : index
    %c0_40 = arith.constant 0 : index
    %101 = vector.load %arg9[%c0_38, %c0_39, %c0_40] : memref<2x64x32xf32, #tpu.memory_space<vmem>>, vector<1x64x32xf32>
    %102 = vector.shape_cast %101 : vector<1x64x32xf32> to vector<64x32xf32>
    %cst_41 = arith.constant dense<0.000000e+00> : vector<16x32xf32>
    %103 = tpu.matmul %100, %102, %cst_41 {dimension_numbers = #tpu.dot_dimension_numbers<[1], [0], [0], [1], [0, 0, 1, 1], [], []>} : vector<16x64xf32>, vector<64x32xf32>, vector<16x32xf32> -> vector<16x32xf32>
    %c0_42 = arith.constant 0 : index
    %c0_43 = arith.constant 0 : index
    %c0_44 = arith.constant 0 : index
    %104 = vector.load %arg10[%c0_42, %c0_43, %c0_44] : memref<2x1x32xf32, #tpu.memory_space<vmem>>, vector<1x1x32xf32>
    %105 = vector.shape_cast %104 : vector<1x1x32xf32> to vector<1x32xf32>
    %106 = vector.broadcast %105 : vector<1x32xf32> to vector<16x32xf32>
    %107 = arith.addf %103, %106 : vector<16x32xf32>
    %108 = arith.addf %91, %107 : vector<16x32xf32>
    %c0_45 = arith.constant 0 : index
    %c0_46 = arith.constant 0 : index
    %c0_47 = arith.constant 0 : index
    %109 = vector.load %arg11[%c0_45, %c0_46, %c0_47] : memref<2x1x32xf32, #tpu.memory_space<vmem>>, vector<1x1x32xf32>
    %110 = vector.shape_cast %109 : vector<1x1x32xf32> to vector<1x32xf32>
    %c0_48 = arith.constant 0 : index
    %c0_49 = arith.constant 0 : index
    %c0_50 = arith.constant 0 : index
    %111 = vector.load %arg12[%c0_48, %c0_49, %c0_50] : memref<2x1x32xf32, #tpu.memory_space<vmem>>, vector<1x1x32xf32>
    %112 = vector.shape_cast %111 : vector<1x1x32xf32> to vector<1x32xf32>
    %cst_51 = arith.constant dense<0.000000e+00> : vector<16xf32>
    %113 = vector.multi_reduction <add>, %108, %cst_51 [1] : vector<16x32xf32> to vector<16xf32>
    %114 = vector.shape_cast %113 : vector<16xf32> to vector<16x1xf32>
    %cst_52 = arith.constant 3.200000e+01 : f32
    %115 = vector.broadcast %cst_52 : f32 to vector<16x1xf32>
    %116 = arith.divf %114, %115 : vector<16x1xf32>
    %117 = vector.broadcast %116 : vector<16x1xf32> to vector<16x32xf32>
    %118 = arith.subf %108, %117 : vector<16x32xf32>
    %119 = arith.mulf %118, %118 : vector<16x32xf32>
    %cst_53 = arith.constant dense<0.000000e+00> : vector<16xf32>
    %120 = vector.multi_reduction <add>, %119, %cst_53 [1] : vector<16x32xf32> to vector<16xf32>
    %121 = vector.shape_cast %120 : vector<16xf32> to vector<16x1xf32>
    %cst_54 = arith.constant 3.200000e+01 : f32
    %122 = vector.broadcast %cst_54 : f32 to vector<16x1xf32>
    %123 = arith.divf %121, %122 : vector<16x1xf32>
    %124 = vector.broadcast %116 : vector<16x1xf32> to vector<16x32xf32>
    %125 = arith.subf %108, %124 : vector<16x32xf32>
    %cst_55 = arith.constant 9.99999974E-6 : f32
    %126 = vector.broadcast %cst_55 : f32 to vector<16x1xf32>
    %127 = arith.addf %123, %126 : vector<16x1xf32>
    %128 = math.rsqrt %127 : vector<16x1xf32>
    %129 = vector.broadcast %128 : vector<16x1xf32> to vector<16x32xf32>
    %130 = arith.mulf %125, %129 : vector<16x32xf32>
    %131 = vector.broadcast %110 : vector<1x32xf32> to vector<16x32xf32>
    %132 = arith.mulf %130, %131 : vector<16x32xf32>
    %133 = vector.broadcast %112 : vector<1x32xf32> to vector<16x32xf32>
    %134 = arith.addf %132, %133 : vector<16x32xf32>
    %c1 = arith.constant 1 : index
    %c0_56 = arith.constant 0 : index
    %c0_57 = arith.constant 0 : index
    %135 = vector.load %arg1[%c1, %c0_56, %c0_57] : memref<2x32x96xf32, #tpu.memory_space<vmem>>, vector<1x32x96xf32>
    %136 = vector.shape_cast %135 : vector<1x32x96xf32> to vector<32x96xf32>
    %cst_58 = arith.constant dense<0.000000e+00> : vector<16x96xf32>
    %137 = tpu.matmul %134, %136, %cst_58 {dimension_numbers = #tpu.dot_dimension_numbers<[1], [0], [0], [1], [0, 0, 1, 1], [], []>} : vector<16x32xf32>, vector<32x96xf32>, vector<16x96xf32> -> vector<16x96xf32>
    %c1_59 = arith.constant 1 : index
    %c0_60 = arith.constant 0 : index
    %c0_61 = arith.constant 0 : index
    %138 = vector.load %arg2[%c1_59, %c0_60, %c0_61] : memref<2x1x96xf32, #tpu.memory_space<vmem>>, vector<1x1x96xf32>
    %139 = vector.shape_cast %138 : vector<1x1x96xf32> to vector<1x96xf32>
    %140 = vector.broadcast %139 : vector<1x96xf32> to vector<16x96xf32>
    %141 = arith.addf %137, %140 : vector<16x96xf32>
    %142 = vector.extract_strided_slice %141 {offsets = [0, 0], sizes = [16, 32], strides = [1, 1]} : vector<16x96xf32> to vector<16x32xf32>
    %143 = vector.extract_strided_slice %141 {offsets = [0, 32], sizes = [16, 32], strides = [1, 1]} : vector<16x96xf32> to vector<16x32xf32>
    %144 = vector.extract_strided_slice %141 {offsets = [0, 64], sizes = [16, 32], strides = [1, 1]} : vector<16x96xf32> to vector<16x32xf32>
    %145 = vector.extract_strided_slice %142 {offsets = [0, 0], sizes = [16, 8], strides = [1, 1]} : vector<16x32xf32> to vector<16x8xf32>
    %146 = vector.shape_cast %145 : vector<16x8xf32> to vector<2x8x8xf32>
    %147 = vector.extract_strided_slice %142 {offsets = [0, 8], sizes = [16, 8], strides = [1, 1]} : vector<16x32xf32> to vector<16x8xf32>
    %148 = vector.shape_cast %147 : vector<16x8xf32> to vector<2x8x8xf32>
    %149 = vector.extract_strided_slice %142 {offsets = [0, 16], sizes = [16, 8], strides = [1, 1]} : vector<16x32xf32> to vector<16x8xf32>
    %150 = vector.shape_cast %149 : vector<16x8xf32> to vector<2x8x8xf32>
    %151 = vector.extract_strided_slice %142 {offsets = [0, 24], sizes = [16, 8], strides = [1, 1]} : vector<16x32xf32> to vector<16x8xf32>
    %152 = vector.shape_cast %151 : vector<16x8xf32> to vector<2x8x8xf32>
    %153 = tpu.concatenate %146, %148, %150, %152 in 0 : vector<2x8x8xf32>, vector<2x8x8xf32>, vector<2x8x8xf32>, vector<2x8x8xf32> -> vector<8x8x8xf32>
    %154 = vector.extract_strided_slice %143 {offsets = [0, 0], sizes = [16, 8], strides = [1, 1]} : vector<16x32xf32> to vector<16x8xf32>
    %155 = vector.shape_cast %154 : vector<16x8xf32> to vector<2x8x8xf32>
    %156 = vector.extract_strided_slice %143 {offsets = [0, 8], sizes = [16, 8], strides = [1, 1]} : vector<16x32xf32> to vector<16x8xf32>
    %157 = vector.shape_cast %156 : vector<16x8xf32> to vector<2x8x8xf32>
    %158 = vector.extract_strided_slice %143 {offsets = [0, 16], sizes = [16, 8], strides = [1, 1]} : vector<16x32xf32> to vector<16x8xf32>
    %159 = vector.shape_cast %158 : vector<16x8xf32> to vector<2x8x8xf32>
    %160 = vector.extract_strided_slice %143 {offsets = [0, 24], sizes = [16, 8], strides = [1, 1]} : vector<16x32xf32> to vector<16x8xf32>
    %161 = vector.shape_cast %160 : vector<16x8xf32> to vector<2x8x8xf32>
    %162 = tpu.concatenate %155, %157, %159, %161 in 0 : vector<2x8x8xf32>, vector<2x8x8xf32>, vector<2x8x8xf32>, vector<2x8x8xf32> -> vector<8x8x8xf32>
    %163 = vector.extract_strided_slice %144 {offsets = [0, 0], sizes = [16, 8], strides = [1, 1]} : vector<16x32xf32> to vector<16x8xf32>
    %164 = vector.shape_cast %163 : vector<16x8xf32> to vector<2x8x8xf32>
    %165 = vector.extract_strided_slice %144 {offsets = [0, 8], sizes = [16, 8], strides = [1, 1]} : vector<16x32xf32> to vector<16x8xf32>
    %166 = vector.shape_cast %165 : vector<16x8xf32> to vector<2x8x8xf32>
    %167 = vector.extract_strided_slice %144 {offsets = [0, 16], sizes = [16, 8], strides = [1, 1]} : vector<16x32xf32> to vector<16x8xf32>
    %168 = vector.shape_cast %167 : vector<16x8xf32> to vector<2x8x8xf32>
    %169 = vector.extract_strided_slice %144 {offsets = [0, 24], sizes = [16, 8], strides = [1, 1]} : vector<16x32xf32> to vector<16x8xf32>
    %170 = vector.shape_cast %169 : vector<16x8xf32> to vector<2x8x8xf32>
    %171 = tpu.concatenate %164, %166, %168, %170 in 0 : vector<2x8x8xf32>, vector<2x8x8xf32>, vector<2x8x8xf32>, vector<2x8x8xf32> -> vector<8x8x8xf32>
    "tpu.trace_start"() <{level = 10 : i32, message = "gsd,gtd->gst"}> : () -> ()
    %cst_62 = arith.constant dense<0.000000e+00> : vector<8x8x8xf32>
    %172 = tpu.matmul %153, %162, %cst_62 {dimension_numbers = #tpu.dot_dimension_numbers<[2], [2], [1], [1], [0, 0, 0, 1, 1, 1], [0], [0]>} : vector<8x8x8xf32>, vector<8x8x8xf32>, vector<8x8x8xf32> -> vector<8x8x8xf32>
    "tpu.trace_stop"() : () -> ()
    %cst_63 = arith.constant 0.353553385 : f32
    %173 = vector.broadcast %cst_63 : f32 to vector<8x8x8xf32>
    %174 = arith.mulf %172, %173 : vector<8x8x8xf32>
    %cst_64 = arith.constant dense<0xFF800000> : vector<8x8xf32>
    %175 = vector.multi_reduction <maximumf>, %174, %cst_64 [2] : vector<8x8x8xf32> to vector<8x8xf32>
    %176 = vector.shape_cast %175 : vector<8x8xf32> to vector<8x8x1xf32>
    %177 = vector.broadcast %176 : vector<8x8x1xf32> to vector<8x8x8xf32>
    %178 = arith.subf %174, %177 : vector<8x8x8xf32>
    %179 = math.exp %178 : vector<8x8x8xf32>
    %cst_65 = arith.constant dense<0.000000e+00> : vector<8x8xf32>
    %180 = vector.multi_reduction <add>, %179, %cst_65 [2] : vector<8x8x8xf32> to vector<8x8xf32>
    %181 = vector.shape_cast %180 : vector<8x8xf32> to vector<8x8x1xf32>
    %182 = tpu.reciprocal %181 {approx = true} : vector<8x8x1xf32> -> vector<8x8x1xf32>
    %183 = vector.broadcast %182 : vector<8x8x1xf32> to vector<8x8x8xf32>
    %184 = arith.mulf %179, %183 : vector<8x8x8xf32>
    "tpu.trace_start"() <{level = 10 : i32, message = "gst,gtd->gsd"}> : () -> ()
    %cst_66 = arith.constant dense<0.000000e+00> : vector<8x8x8xf32>
    %185 = tpu.matmul %184, %171, %cst_66 {dimension_numbers = #tpu.dot_dimension_numbers<[2], [1], [1], [2], [0, 0, 0, 1, 1, 2], [0], [0]>} : vector<8x8x8xf32>, vector<8x8x8xf32>, vector<8x8x8xf32> -> vector<8x8x8xf32>
    "tpu.trace_stop"() : () -> ()
    %186 = vector.extract_strided_slice %185 {offsets = [0, 0, 0], sizes = [2, 8, 8], strides = [1, 1, 1]} : vector<8x8x8xf32> to vector<2x8x8xf32>
    %187 = vector.extract_strided_slice %185 {offsets = [2, 0, 0], sizes = [2, 8, 8], strides = [1, 1, 1]} : vector<8x8x8xf32> to vector<2x8x8xf32>
    %188 = vector.extract_strided_slice %185 {offsets = [4, 0, 0], sizes = [2, 8, 8], strides = [1, 1, 1]} : vector<8x8x8xf32> to vector<2x8x8xf32>
    %189 = vector.extract_strided_slice %185 {offsets = [6, 0, 0], sizes = [2, 8, 8], strides = [1, 1, 1]} : vector<8x8x8xf32> to vector<2x8x8xf32>
    %190 = tpu.concatenate %186, %187, %188, %189 in 2 : vector<2x8x8xf32>, vector<2x8x8xf32>, vector<2x8x8xf32>, vector<2x8x8xf32> -> vector<2x8x32xf32>
    %191 = vector.shape_cast %190 : vector<2x8x32xf32> to vector<16x32xf32>
    %c1_67 = arith.constant 1 : index
    %c0_68 = arith.constant 0 : index
    %c0_69 = arith.constant 0 : index
    %192 = vector.load %arg3[%c1_67, %c0_68, %c0_69] : memref<2x32x32xf32, #tpu.memory_space<vmem>>, vector<1x32x32xf32>
    %193 = vector.shape_cast %192 : vector<1x32x32xf32> to vector<32x32xf32>
    %cst_70 = arith.constant dense<0.000000e+00> : vector<16x32xf32>
    %194 = tpu.matmul %191, %193, %cst_70 {dimension_numbers = #tpu.dot_dimension_numbers<[1], [0], [0], [1], [0, 0, 1, 1], [], []>} : vector<16x32xf32>, vector<32x32xf32>, vector<16x32xf32> -> vector<16x32xf32>
    %c1_71 = arith.constant 1 : index
    %c0_72 = arith.constant 0 : index
    %c0_73 = arith.constant 0 : index
    %195 = vector.load %arg4[%c1_71, %c0_72, %c0_73] : memref<2x1x32xf32, #tpu.memory_space<vmem>>, vector<1x1x32xf32>
    %196 = vector.shape_cast %195 : vector<1x1x32xf32> to vector<1x32xf32>
    %197 = vector.broadcast %196 : vector<1x32xf32> to vector<16x32xf32>
    %198 = arith.addf %194, %197 : vector<16x32xf32>
    %199 = arith.addf %134, %198 : vector<16x32xf32>
    %c1_74 = arith.constant 1 : index
    %c0_75 = arith.constant 0 : index
    %c0_76 = arith.constant 0 : index
    %200 = vector.load %arg5[%c1_74, %c0_75, %c0_76] : memref<2x1x32xf32, #tpu.memory_space<vmem>>, vector<1x1x32xf32>
    %201 = vector.shape_cast %200 : vector<1x1x32xf32> to vector<1x32xf32>
    %c1_77 = arith.constant 1 : index
    %c0_78 = arith.constant 0 : index
    %c0_79 = arith.constant 0 : index
    %202 = vector.load %arg6[%c1_77, %c0_78, %c0_79] : memref<2x1x32xf32, #tpu.memory_space<vmem>>, vector<1x1x32xf32>
    %203 = vector.shape_cast %202 : vector<1x1x32xf32> to vector<1x32xf32>
    %cst_80 = arith.constant dense<0.000000e+00> : vector<16xf32>
    %204 = vector.multi_reduction <add>, %199, %cst_80 [1] : vector<16x32xf32> to vector<16xf32>
    %205 = vector.shape_cast %204 : vector<16xf32> to vector<16x1xf32>
    %cst_81 = arith.constant 3.200000e+01 : f32
    %206 = vector.broadcast %cst_81 : f32 to vector<16x1xf32>
    %207 = arith.divf %205, %206 : vector<16x1xf32>
    %208 = vector.broadcast %207 : vector<16x1xf32> to vector<16x32xf32>
    %209 = arith.subf %199, %208 : vector<16x32xf32>
    %210 = arith.mulf %209, %209 : vector<16x32xf32>
    %cst_82 = arith.constant dense<0.000000e+00> : vector<16xf32>
    %211 = vector.multi_reduction <add>, %210, %cst_82 [1] : vector<16x32xf32> to vector<16xf32>
    %212 = vector.shape_cast %211 : vector<16xf32> to vector<16x1xf32>
    %cst_83 = arith.constant 3.200000e+01 : f32
    %213 = vector.broadcast %cst_83 : f32 to vector<16x1xf32>
    %214 = arith.divf %212, %213 : vector<16x1xf32>
    %215 = vector.broadcast %207 : vector<16x1xf32> to vector<16x32xf32>
    %216 = arith.subf %199, %215 : vector<16x32xf32>
    %cst_84 = arith.constant 9.99999974E-6 : f32
    %217 = vector.broadcast %cst_84 : f32 to vector<16x1xf32>
    %218 = arith.addf %214, %217 : vector<16x1xf32>
    %219 = math.rsqrt %218 : vector<16x1xf32>
    %220 = vector.broadcast %219 : vector<16x1xf32> to vector<16x32xf32>
    %221 = arith.mulf %216, %220 : vector<16x32xf32>
    %222 = vector.broadcast %201 : vector<1x32xf32> to vector<16x32xf32>
    %223 = arith.mulf %221, %222 : vector<16x32xf32>
    %224 = vector.broadcast %203 : vector<1x32xf32> to vector<16x32xf32>
    %225 = arith.addf %223, %224 : vector<16x32xf32>
    %c1_85 = arith.constant 1 : index
    %c0_86 = arith.constant 0 : index
    %c0_87 = arith.constant 0 : index
    %226 = vector.load %arg7[%c1_85, %c0_86, %c0_87] : memref<2x32x64xf32, #tpu.memory_space<vmem>>, vector<1x32x64xf32>
    %227 = vector.shape_cast %226 : vector<1x32x64xf32> to vector<32x64xf32>
    %cst_88 = arith.constant dense<0.000000e+00> : vector<16x64xf32>
    %228 = tpu.matmul %225, %227, %cst_88 {dimension_numbers = #tpu.dot_dimension_numbers<[1], [0], [0], [1], [0, 0, 1, 1], [], []>} : vector<16x32xf32>, vector<32x64xf32>, vector<16x64xf32> -> vector<16x64xf32>
    %c1_89 = arith.constant 1 : index
    %c0_90 = arith.constant 0 : index
    %c0_91 = arith.constant 0 : index
    %229 = vector.load %arg8[%c1_89, %c0_90, %c0_91] : memref<2x1x64xf32, #tpu.memory_space<vmem>>, vector<1x1x64xf32>
    %230 = vector.shape_cast %229 : vector<1x1x64xf32> to vector<1x64xf32>
    %231 = vector.broadcast %230 : vector<1x64xf32> to vector<16x64xf32>
    %232 = arith.addf %228, %231 : vector<16x64xf32>
    %cst_92 = arith.constant 0.000000e+00 : f32
    %233 = vector.broadcast %cst_92 : f32 to vector<16x64xf32>
    %234 = arith.maximumf %232, %233 : vector<16x64xf32>
    %c1_93 = arith.constant 1 : index
    %c0_94 = arith.constant 0 : index
    %c0_95 = arith.constant 0 : index
    %235 = vector.load %arg9[%c1_93, %c0_94, %c0_95] : memref<2x64x32xf32, #tpu.memory_space<vmem>>, vector<1x64x32xf32>
    %236 = vector.shape_cast %235 : vector<1x64x32xf32> to vector<64x32xf32>
    %cst_96 = arith.constant dense<0.000000e+00> : vector<16x32xf32>
    %237 = tpu.matmul %234, %236, %cst_96 {dimension_numbers = #tpu.dot_dimension_numbers<[1], [0], [0], [1], [0, 0, 1, 1], [], []>} : vector<16x64xf32>, vector<64x32xf32>, vector<16x32xf32> -> vector<16x32xf32>
    %c1_97 = arith.constant 1 : index
    %c0_98 = arith.constant 0 : index
    %c0_99 = arith.constant 0 : index
    %238 = vector.load %arg10[%c1_97, %c0_98, %c0_99] : memref<2x1x32xf32, #tpu.memory_space<vmem>>, vector<1x1x32xf32>
    %239 = vector.shape_cast %238 : vector<1x1x32xf32> to vector<1x32xf32>
    %240 = vector.broadcast %239 : vector<1x32xf32> to vector<16x32xf32>
    %241 = arith.addf %237, %240 : vector<16x32xf32>
    %242 = arith.addf %225, %241 : vector<16x32xf32>
    %c1_100 = arith.constant 1 : index
    %c0_101 = arith.constant 0 : index
    %c0_102 = arith.constant 0 : index
    %243 = vector.load %arg11[%c1_100, %c0_101, %c0_102] : memref<2x1x32xf32, #tpu.memory_space<vmem>>, vector<1x1x32xf32>
    %244 = vector.shape_cast %243 : vector<1x1x32xf32> to vector<1x32xf32>
    %c1_103 = arith.constant 1 : index
    %c0_104 = arith.constant 0 : index
    %c0_105 = arith.constant 0 : index
    %245 = vector.load %arg12[%c1_103, %c0_104, %c0_105] : memref<2x1x32xf32, #tpu.memory_space<vmem>>, vector<1x1x32xf32>
    %246 = vector.shape_cast %245 : vector<1x1x32xf32> to vector<1x32xf32>
    %cst_106 = arith.constant dense<0.000000e+00> : vector<16xf32>
    %247 = vector.multi_reduction <add>, %242, %cst_106 [1] : vector<16x32xf32> to vector<16xf32>
    %248 = vector.shape_cast %247 : vector<16xf32> to vector<16x1xf32>
    %cst_107 = arith.constant 3.200000e+01 : f32
    %249 = vector.broadcast %cst_107 : f32 to vector<16x1xf32>
    %250 = arith.divf %248, %249 : vector<16x1xf32>
    %251 = vector.broadcast %250 : vector<16x1xf32> to vector<16x32xf32>
    %252 = arith.subf %242, %251 : vector<16x32xf32>
    %253 = arith.mulf %252, %252 : vector<16x32xf32>
    %cst_108 = arith.constant dense<0.000000e+00> : vector<16xf32>
    %254 = vector.multi_reduction <add>, %253, %cst_108 [1] : vector<16x32xf32> to vector<16xf32>
    %255 = vector.shape_cast %254 : vector<16xf32> to vector<16x1xf32>
    %cst_109 = arith.constant 3.200000e+01 : f32
    %256 = vector.broadcast %cst_109 : f32 to vector<16x1xf32>
    %257 = arith.divf %255, %256 : vector<16x1xf32>
    %258 = vector.broadcast %250 : vector<16x1xf32> to vector<16x32xf32>
    %259 = arith.subf %242, %258 : vector<16x32xf32>
    %cst_110 = arith.constant 9.99999974E-6 : f32
    %260 = vector.broadcast %cst_110 : f32 to vector<16x1xf32>
    %261 = arith.addf %257, %260 : vector<16x1xf32>
    %262 = math.rsqrt %261 : vector<16x1xf32>
    %263 = vector.broadcast %262 : vector<16x1xf32> to vector<16x32xf32>
    %264 = arith.mulf %259, %263 : vector<16x32xf32>
    %265 = vector.broadcast %244 : vector<1x32xf32> to vector<16x32xf32>
    %266 = arith.mulf %264, %265 : vector<16x32xf32>
    %267 = vector.broadcast %246 : vector<1x32xf32> to vector<16x32xf32>
    %268 = arith.addf %266, %267 : vector<16x32xf32>
    %c0_111 = arith.constant 0 : index
    %c0_112 = arith.constant 0 : index
    %269 = vector.load %arg13[%c0_111, %c0_112] : memref<1x32xf32, #tpu.memory_space<vmem>>, vector<1x32xf32>
    %c0_113 = arith.constant 0 : index
    %c0_114 = arith.constant 0 : index
    %270 = vector.load %arg14[%c0_113, %c0_114] : memref<1x32xf32, #tpu.memory_space<vmem>>, vector<1x32xf32>
    %cst_115 = arith.constant dense<0.000000e+00> : vector<16xf32>
    %271 = vector.multi_reduction <add>, %268, %cst_115 [1] : vector<16x32xf32> to vector<16xf32>
    %272 = vector.shape_cast %271 : vector<16xf32> to vector<16x1xf32>
    %cst_116 = arith.constant 3.200000e+01 : f32
    %273 = vector.broadcast %cst_116 : f32 to vector<16x1xf32>
    %274 = arith.divf %272, %273 : vector<16x1xf32>
    %275 = vector.broadcast %274 : vector<16x1xf32> to vector<16x32xf32>
    %276 = arith.subf %268, %275 : vector<16x32xf32>
    %277 = arith.mulf %276, %276 : vector<16x32xf32>
    %cst_117 = arith.constant dense<0.000000e+00> : vector<16xf32>
    %278 = vector.multi_reduction <add>, %277, %cst_117 [1] : vector<16x32xf32> to vector<16xf32>
    %279 = vector.shape_cast %278 : vector<16xf32> to vector<16x1xf32>
    %cst_118 = arith.constant 3.200000e+01 : f32
    %280 = vector.broadcast %cst_118 : f32 to vector<16x1xf32>
    %281 = arith.divf %279, %280 : vector<16x1xf32>
    %282 = vector.broadcast %274 : vector<16x1xf32> to vector<16x32xf32>
    %283 = arith.subf %268, %282 : vector<16x32xf32>
    %cst_119 = arith.constant 9.99999974E-6 : f32
    %284 = vector.broadcast %cst_119 : f32 to vector<16x1xf32>
    %285 = arith.addf %281, %284 : vector<16x1xf32>
    %286 = math.rsqrt %285 : vector<16x1xf32>
    %287 = vector.broadcast %286 : vector<16x1xf32> to vector<16x32xf32>
    %288 = arith.mulf %283, %287 : vector<16x32xf32>
    %289 = vector.broadcast %269 : vector<1x32xf32> to vector<16x32xf32>
    %290 = arith.mulf %288, %289 : vector<16x32xf32>
    %291 = vector.broadcast %270 : vector<1x32xf32> to vector<16x32xf32>
    %292 = arith.addf %290, %291 : vector<16x32xf32>
    %c0_120 = arith.constant 0 : index
    %c0_121 = arith.constant 0 : index
    %293 = vector.load %arg15[%c0_120, %c0_121] : memref<16x32xf32, #tpu.memory_space<vmem>>, vector<16x32xf32>
    tpu.vector_store %arg15[%c0_120, %c0_121], %292 {strides = array<i32>} : memref<16x32xf32, #tpu.memory_space<vmem>>, vector<16x32xf32>,
    return
  }
}

</mosaic_0001>

<bundles_post_ra>
// kernel: tpu_custom_call.1
= control target key start
LH: loop header
LB: loop body
LE: loop exit
PB: predicated region body
PF: predicated region fallthrough
CT: control target
= control target key end

     0   :  { %20 = vsyncpa [#allocation3], 0  ;;  %s5222_s0 = inlined_call_operand.hbm [shape: f32[16,32], index: 0, kind: input, shape index: {}]   ;;  %s5223_s1 = inlined_call_operand.vmem [shape: f32[2,32,96], index: 1, kind: input, shape index: {}]   ;;  %s5224_s2 = inlined_call_operand.vmem [shape: f32[2,1,96], index: 2, kind: input, shape index: {}]   ;;  %s5225_s3 = inlined_call_operand.vmem [shape: f32[2,32,32], index: 3, kind: input, shape index: {}]   ;;  %s5226_s4 = inlined_call_operand.vmem [shape: f32[2,1,32], index: 4, kind: input, shape index: {}]   ;;  %s5227_s5 = inlined_call_operand.vmem [shape: f32[2,1,32], index: 5, kind: input, shape index: {}]   ;;  %s5228_s6 = inlined_call_operand.vmem [shape: f32[2,1,32], index: 6, kind: input, shape index: {}]   ;;  %s5229_s7 = inlined_call_operand.vmem [shape: f32[2,32,64], index: 7, kind: input, shape index: {}]   ;;  %s5230_s8 = inlined_call_operand.vmem [shape: f32[2,1,64], index: 8, kind: input, shape index: {}]   ;;  %s5231_s9 = inlined_call_operand.vmem [shape: f32[2,64,32], index: 9, kind: input, shape index: {}]   ;;  %s5232_s10 = inlined_call_operand.vmem [shape: f32[2,1,32], index: 10, kind: input, shape index: {}]   ;;  %s5233_s11 = inlined_call_operand.vmem [shape: f32[2,1,32], index: 11, kind: input, shape index: {}]   ;;  %s5234_s12 = inlined_call_operand.vmem [shape: f32[2,1,32], index: 12, kind: input, shape index: {}]   ;;  %s5235_s13 = inlined_call_operand.vmem [shape: f32[1,32], index: 13, kind: input, shape index: {}]   ;;  %s5236_s14 = inlined_call_operand.vmem [shape: f32[1,32], index: 14, kind: input, shape index: {}]   ;;  %s5237_s15 = inlined_call_operand.hbm [shape: f32[16,32], index: 15, kind: output, shape index: {}]  }
   0x1   :  { %21 = vsyncpa [#allocation4], 0  ;;  %s4511_s18 = smov [#allocation2]   ;;  %s4463_s22 = scalar_lea.hbm %s5222_s0, 256 }
   0x2   :  { %s27_s19 = sshll.u32 %s4511_s18, 4  ;;  %p4464_p0 = scmp.ne.s32.totalorder %s5222_s0, %s4463_s22  ;;  %s28_s19 = int_to_ptr.vmem [resolvable:$true] %s27_s19 }
   0x3   :  { %p4467_p1 = scmp.lt.u32.totalorder %s4463_s22, %s5222_s0 }
   0x5   :  { %p4469_p2 = pnand %p4467_p1, %p4464_p0 }
   0x7   :  { %4472 = shalt.err (!%p4469_p2)
}
   0x8   :  { %s4473_s27 = scalar_lea.vmem %s28_s19, 256  ;;  %p4478_p4 = scmp.lt.s32.totalorder %s28_s19, %s28_s19 }
   0x9   :  { %p4474_p3 = scmp.ne.s32.totalorder %s28_s19, %s4473_s27  ;;  %p4479_p5 = scmp.lt.s32.totalorder %s4473_s27, %s4473_s27 }
   0xb   :  { %p4480_p6 = por %p4479_p5, %p4478_p4 }
   0xd   :  { %p4481_p7 = pnand %p4480_p6, %p4474_p3 }
   0xf   :  { %4484 = shalt.err (!%p4481_p7)
}
  0x10   :  { %s5238_s28 = smov 128   ;;  %s4513_s29 = smov 8  }
  0x11   :  { %33 = dma.hbm_to_vmem [thread:$0]  %s5222_s0, 256, %s28_s19, [#allocation3], %s5238_s28, %s5238_s28, %s4513_s29  }
  0x12   :  { %4507 = dma.done.wait [#allocation3], 256  }
  0x13   :  { %4508 = vsyncadd [#allocation3], 4294967040  ;;  %vm78_vm0 = vcmask 261120   ;;  %v67_v0 = vld [vmem:[%s5223_s1] sm:$0xff]  ;;  %v68_v1 = vld [vmem:[%s5223_s1 + $0x8] sm:$0xff]  ;;  %v4514_v10 = vmov 0.0  }
  0x14   :  { %v69_v2 = vld [vmem:[%s5223_s1 + $0x10] sm:$0xff]  ;;  %v4286_v3 = vpack.c.bf16 %v68_v1, %v67_v0  ;;  %v70_v4 = vld [vmem:[%s5223_s1 + $0x18] sm:$0xff]  ;;  %v4631_v5 = vld [vmem:[#allocation2] sm:$0xff]  ;;  %4043 = vmatprep.subr.mxu0 %v4514_v10  ;;  %s4515_s26 = smov 112   ;;  %s4516_s27 = smov 120   ;;  %vm4517_vm1 = vmmov 0  }
  0x15   :  { %v4290_v6 = vpack.c.bf16 %v70_v4, %v69_v2  ;;  %4030 = vmatprep.mubr.msk.f32.mxu1 %vm78_vm0, %v4631_v5  ;;  %v4635_v7 = vld [vmem:[#allocation2 + $0x8] sm:$0xff]  ;;  %v3792_v8 = vld [vmem:[%s5224_s2] ss:$0 sm:$0xff]  ;;  %4045 = vmatprep.mubr.msk.f32.mxu0 %vm4517_vm1, %v4514_v10  ;;  %s4518_s30 = smov 104   ;;  %s4519_s16 = smov 96   ;;  %vm176_vm2 = vcmask 64512  }
  0x16   :  { %4287 = vmatprep.subr.bf16.mxu1 %v4286_v3  ;;  %s4520_s17 = smov 64   ;;  %s5241_s19 = smov 16   ;;  %vm1513_vm3 = vcmask 130048   ;;  %vm1516_vm4 = vcmask 195584   ;;  %vm1767_vm5 = vcmask 523264  }
  0x17   :  { %4289 = vmatpush3.bf16.msra.mxu1 %v4286_v3  ;;  %s5239_s18 = smov 24   ;;  %s5243_s21 = smov 16  }
  0x18   :  { %4291 = vmatprep.subr.bf16.mxu1 %v4290_v6  ;;  %s4523_s20 = smov [#allocation5]  }
  0x19   :  { %s3780_s28 = sshll.u32 %s4523_s20, 4  ;;  %s3781_s28 = int_to_ptr.vmem [resolvable:$true] %s3780_s28 }
  0x1a   :  { %p4490_p9 = scmp.lt.s32.totalorder %s3781_s28, %s3781_s28 }
  0x1b   :  { %4293 = vmatpush3.bf16.msra.mxu1 %v4290_v6 }
  0x1c   :  { %4033 = vmatprep.subr.mxu1 %v4514_v10 }
  0x1e   :  { %4031 = vmatmul.mubr.msk.f32.vlgmr.msra.gmra.mrb[0].mxu1 %vm78_vm0, %v4635_v7 }
  0x1f   :  { %4035 = vmatprep.mubr.msk.f32.mxu1 %vm4517_vm1, %v4514_v10 }
  0xf1   :  { %v4032_v9 = vpop.f32.mrb[0].mxu1 }
  0xf2   :  { %v151_v11 = vpop.f32.mrb[1].mxu1  ;;  %v4654_v13 = vadd.f32 %v4032_v9, %v3792_v8 }
  0xf3   :  { %v4644_v12 = vadd.f32 %v3792_v8, %v151_v11 }
  0xf5   :  { %166 = vrot.lane.b32.xlu1 %v4644_v12, %s4515_s26  ;;  %162 = vrot.lane.b32.xlu0 %v4644_v12, %s4516_s27 }
  0xf9   :  { %168 = vrot.lane.b32.xlu1 %v4654_v13, %s4515_s26  ;;  %164 = vrot.lane.b32.xlu0 %v4654_v13, %s4516_s27 }
  0xfd   :  { %172 = vrot.lane.b32.xlu1 %v4654_v13, %s4518_s30  ;;  %170 = vrot.lane.b32.xlu0 %v4644_v12, %s4518_s30 }
 0x101   :  { %251 = vrot.lane.b32.xlu1 %v4654_v13, %s4519_s16  ;;  %174 = vrot.lane.b32.xlu0 %v4644_v12, %s4519_s16 }
 0x167   :  { %v4668_v14 = vpop.permute.xlu1 %166  ;;  %v4670_v15 = vpop.permute.xlu0 %162 }
 0x168   :  { %327 = vrot.lane.b32.xlu0 %v4670_v15, %s4519_s16 }
 0x16b   :  { %v4674_v16 = vpop.permute.xlu1 %168  ;;  %v4676_v17 = vpop.permute.xlu0 %164 }
 0x16c   :  { %479 = vrot.lane.b32.xlu0 %v4668_v14, %s4519_s16  ;;  %403 = vrot.lane.b32.xlu1 %v4676_v17, %s4519_s16 }
 0x16f   :  { %v4682_v18 = vpop.permute.xlu0 %170  ;;  %v4688_v19 = vpop.permute.xlu1 %172 }
 0x170   :  { %555 = vrot.lane.b32.xlu1 %v4674_v16, %s4519_s16  ;;  %631 = vrot.lane.b32.xlu0 %v4682_v18, %s4519_s16 }
 0x173   :  { %v175_v20 = vpop.permute.xlu0 %174  ;;  %v252_v21 = vpop.permute.xlu1 %251 }
 0x174   :  { %707 = vrot.lane.b32.xlu1 %v4688_v19, %s4519_s16  ;;  %4034 = vmatpush3.xpose.msk.msra.mxu1 %vm176_vm2, %v175_v20 }
 0x175   :  { %4038 = vmatprep.subr.mxu1 %v4514_v10 }
 0x177   :  { %4036 = vmatmul.mubr.msk.f32.vlgmr.msra.gmra.mrb[2].mxu1 %vm176_vm2, %v4644_v12 }
 0x178   :  { %4039 = vmatpush3.xpose.msk.msra.mxu1 %vm176_vm2, %v252_v21  ;;  %4040 = vmatprep.mubr.msk.f32.mxu1 %vm4517_vm1, %v4514_v10 }
 0x179   :  { %4048 = vmatprep.subr.mxu1 %v4514_v10 }
 0x17b   :  { %4041 = vmatmul.mubr.msk.f32.vlgmr.msra.gmra.mrb[4].mxu1 %vm176_vm2, %v4654_v13 }
 0x17c   :  { %4050 = vmatprep.mubr.msk.f32.mxu1 %vm4517_vm1, %v4514_v10 }
 0x1da   :  { %v328_v22 = vpop.permute.xlu0 %327 }
 0x1db   :  { %4044 = vmatpush3.xpose.msk.msra.mxu0 %vm176_vm2, %v328_v22 }
 0x1dc   :  { %4053 = vmatprep.subr.mxu0 %v4514_v10 }
 0x1de   :  { %v404_v23 = vpop.permute.xlu1 %403  ;;  %4046 = vmatmul.mubr.msk.f32.vlgmr.msra.gmra.mrb[0].mxu0 %vm176_vm2, %v4670_v15  ;;  %v480_v24 = vpop.permute.xlu0 %479 }
 0x1df   :  { %4049 = vmatpush3.xpose.msk.msra.mxu1 %vm176_vm2, %v404_v23  ;;  %4054 = vmatpush3.xpose.msk.msra.mxu0 %vm176_vm2, %v480_v24 }
 0x1e0   :  { %4055 = vmatprep.mubr.msk.f32.mxu0 %vm4517_vm1, %v4514_v10  ;;  %4058 = vmatprep.subr.mxu1 %v4514_v10 }
 0x1e1   :  { %4063 = vmatprep.subr.mxu0 %v4514_v10 }
 0x1e2   :  { %v556_v25 = vpop.permute.xlu1 %555  ;;  %4051 = vmatmul.mubr.msk.f32.vlgmr.msra.gmra.mrb[6].mxu1 %vm176_vm2, %v4676_v17  ;;  %4056 = vmatmul.mubr.msk.f32.vlgmr.msra.gmra.mrb[2].mxu0 %vm176_vm2, %v4668_v14  ;;  %v632_v26 = vpop.permute.xlu0 %631 }
 0x1e3   :  { %4059 = vmatpush3.xpose.msk.msra.mxu1 %vm176_vm2, %v556_v25  ;;  %4064 = vmatpush3.xpose.msk.msra.mxu0 %vm176_vm2, %v632_v26 }
 0x1e4   :  { %4060 = vmatprep.mubr.msk.f32.mxu1 %vm4517_vm1, %v4514_v10  ;;  %4065 = vmatprep.mubr.msk.f32.mxu0 %vm4517_vm1, %v4514_v10 }
 0x1e5   :  { %4068 = vmatprep.subr.mxu1 %v4514_v10  ;;  %4073 = vmatprep.subr.mxu0 %v4514_v10 }
 0x1e6   :  { %v708_v27 = vpop.permute.xlu1 %707  ;;  %4061 = vmatmul.mubr.msk.f32.vlgmr.msra.gmra.mrb[8].mxu1 %vm176_vm2, %v4674_v16  ;;  %4066 = vmatmul.mubr.msk.f32.vlgmr.msra.gmra.mrb[4].mxu0 %vm176_vm2, %v4682_v18 }
 0x1e7   :  { %4069 = vmatpush3.xpose.msk.msra.mxu1 %vm176_vm2, %v708_v27  ;;  %4070 = vmatprep.mubr.msk.f32.mxu1 %vm4517_vm1, %v4514_v10 }
 0x1e8   :  { %4078 = vmatprep.subr.mxu1 %v4514_v10  ;;  %4075 = vmatprep.mubr.msk.f32.mxu0 %vm4517_vm1, %v4514_v10 }
 0x1ea   :  { %4071 = vmatmul.mubr.msk.f32.vlgmr.msra.gmra.mrb[10].mxu1 %vm176_vm2, %v4688_v19 }
 0x1eb   :  { %4080 = vmatprep.mubr.msk.f32.mxu1 %vm4517_vm1, %v4514_v10 }
 0x24a   :  { %v247_v28 = vpop.f32.mrb[2].mxu1 }
 0x24b   :  { %v783_v29 = vmul.f32 0.35355338, %v247_v28  ;;  %v4037_v30 = vpop.f32.mrb[3].mxu1 }
 0x24d   :  { %v791_v31 = vsel %vm176_vm2, %v783_v29, -inf }
 0x24e   :  { %792 = vmax.xlane.f32.xlu0 %v791_v31  ;;  %v323_v32 = vpop.f32.mrb[4].mxu1 }
 0x24f   :  { %v784_v33 = vmul.f32 0.35355338, %v323_v32  ;;  %v4042_v34 = vpop.f32.mrb[5].mxu1 }
 0x251   :  { %v794_v35 = vsel %vm176_vm2, %v784_v33, -inf }
 0x252   :  { %795 = vmax.xlane.f32.xlu1 %v794_v35 }
 0x2b1   :  { %v399_v36 = vpop.f32.mrb[0].mxu0 }
 0x2b2   :  { %v785_v37 = vmul.f32 0.35355338, %v399_v36  ;;  %v4047_v38 = vpop.f32.mrb[1].mxu0 }
 0x2b4   :  { %v797_v39 = vsel %vm176_vm2, %v785_v37, -inf }
 0x2b5   :  { %v475_v40 = vpop.f32.mrb[6].mxu1  ;;  %798 = vmax.xlane.f32.xlu0 %v797_v39  ;;  %v551_v41 = vpop.f32.mrb[2].mxu0 }
 0x2b6   :  { %v786_v42 = vmul.f32 0.35355338, %v475_v40  ;;  %v787_v43 = vmul.f32 0.35355338, %v551_v41  ;;  %v4052_v44 = vpop.f32.mrb[7].mxu1  ;;  %v4057_v45 = vpop.f32.mrb[3].mxu0 }
 0x2b8   :  { %v800_v46 = vsel %vm176_vm2, %v786_v42, -inf  ;;  %v803_v47 = vsel %vm176_vm2, %v787_v43, -inf }
 0x2b9   :  { %v627_v48 = vpop.f32.mrb[8].mxu1  ;;  %801 = vmax.xlane.f32.xlu0 %v800_v46  ;;  %804 = vmax.xlane.f32.xlu1 %v803_v47  ;;  %v703_v49 = vpop.f32.mrb[4].mxu0 }
 0x2ba   :  { %v788_v50 = vmul.f32 0.35355338, %v627_v48  ;;  %v789_v51 = vmul.f32 0.35355338, %v703_v49  ;;  %v4062_v52 = vpop.f32.mrb[9].mxu1  ;;  %v4067_v53 = vpop.f32.mrb[5].mxu0 }
 0x2bc   :  { %v806_v54 = vsel %vm176_vm2, %v788_v50, -inf  ;;  %v809_v55 = vsel %vm176_vm2, %v789_v51, -inf }
 0x2bd   :  { %v779_v56 = vpop.f32.mrb[10].mxu1  ;;  %807 = vmax.xlane.f32.xlu0 %v806_v54  ;;  %810 = vmax.xlane.f32.xlu1 %v809_v55 }
 0x2be   :  { %v790_v57 = vmul.f32 0.35355338, %v779_v56  ;;  %v4072_v58 = vpop.f32.mrb[11].mxu1 }
 0x2c0   :  { %v812_v59 = vsel %vm176_vm2, %v790_v57, -inf }
 0x2c1   :  { %813 = vmax.xlane.f32.xlu0 %v812_v59 }
 0x2ce   :  { %879 = vrot.lane.b32.xlu1 %v4644_v12, %s4520_s17 }
 0x2d2   :  { %1031 = vrot.lane.b32.xlu1 %v4670_v15, %s4520_s17 }
 0x2d6   :  { %1107 = vrot.lane.b32.xlu1 %v4676_v17, %s4520_s17 }
 0x2d7   :  { %955 = vrot.lane.b32.xlu0 %v4654_v13, %s4520_s17 }
 0x2da   :  { %1259 = vrot.lane.b32.xlu1 %v4674_v16, %s4520_s17 }
 0x2db   :  { %1183 = vrot.lane.b32.xlu0 %v4668_v14, %s4520_s17  ;;  %v793_v62 = vpop.xlane.xlu0 %792 }
 0x2dc   :  { %v815_v63 = vsub.f32 %v783_v29, %v793_v62 }
 0x2de   :  { %v823_v1 = vmul.f32 1.442695, %v815_v63 }
 0x2df   :  { %v796_v60 = vpop.xlane.xlu1 %795 }
 0x2e0   :  { %v816_v61 = vsub.f32 %v784_v33, %v796_v60 }
 0x2e2   :  { %v825_v0 = vmul.f32 1.442695, %v816_v61 }
 0x2e4   :  { %4379 = vpow2.f32 %v825_v0 }
 0x2e5   :  { %4381 = vpow2.f32 %v823_v1 }
 0x2ee   :  { %v4760_v2 = vpop.eup %4379 }
 0x2ef   :  { %v842_v3 = vsel %vm176_vm2, %v4760_v2, 0.0  ;;  %v4764_v4 = vpop.eup %4381 }
 0x2f0   :  { %v839_v6 = vsel %vm176_vm2, %v4764_v4, 0.0 }
 0x2fa   :  { %843 = vadd.xlane.f32.xlu0 %v842_v3 }
 0x2fe   :  { %840 = vadd.xlane.f32.xlu1 %v839_v6 }
 0x342   :  { %v799_v8 = vpop.xlane.xlu0 %798 }
 0x343   :  { %v817_v9 = vsub.f32 %v785_v37, %v799_v8 }
 0x345   :  { %v827_v11 = vmul.f32 1.442695, %v817_v9 }
 0x346   :  { %v805_v12 = vpop.xlane.xlu1 %804  ;;  %v802_v13 = vpop.xlane.xlu0 %801 }
 0x347   :  { %4383 = vpow2.f32 %v827_v11  ;;  %v819_v14 = vsub.f32 %v787_v43, %v805_v12  ;;  %v818_v15 = vsub.f32 %v786_v42, %v802_v13 }
 0x349   :  { %v831_v16 = vmul.f32 1.442695, %v819_v14  ;;  %v829_v17 = vmul.f32 1.442695, %v818_v15  ;;  %v1519_v14 = vld [vmem:[%s5225_s3] sm:$0xff]  ;;  %v1520_v15 = vld [vmem:[%s5225_s3 + $0x8] sm:$0xff] }
 0x34a   :  { %v811_v20 = vpop.xlane.xlu1 %810  ;;  %v808_v21 = vpop.xlane.xlu0 %807 }
 0x34b   :  { %4385 = vpow2.f32 %v831_v16  ;;  %v821_v22 = vsub.f32 %v789_v51, %v811_v20  ;;  %v820_v23 = vsub.f32 %v788_v50, %v808_v21  ;;  %v4294_v16 = vpack.c.bf16 %v1520_v15, %v1519_v14  ;;  %v1522_v20 = vld [vmem:[%s5225_s3 + $0x18] sm:$0xff] }
 0x34c   :  { %4387 = vpow2.f32 %v829_v17  ;;  %v1521_v17 = vld [vmem:[%s5225_s3 + $0x10] sm:$0xff] }
 0x34d   :  { %v835_v24 = vmul.f32 1.442695, %v821_v22  ;;  %v833_v25 = vmul.f32 1.442695, %v820_v23  ;;  %v4298_v21 = vpack.c.bf16 %v1522_v20, %v1521_v17 }
 0x34e   :  { %v880_v26 = vpop.permute.xlu1 %879  ;;  %v814_v27 = vpop.xlane.xlu0 %813 }
 0x34f   :  { %4389 = vpow2.f32 %v835_v24  ;;  %v822_v28 = vsub.f32 %v790_v57, %v814_v27  ;;  %4074 = vmatpush3.msra.mxu0 %v880_v26 }
 0x350   :  { %4391 = vpow2.f32 %v833_v25  ;;  %4083 = vmatprep.subr.mxu0 %v4514_v10 }
 0x351   :  { %v4384_v29 = vpop.eup %4383  ;;  %v837_v30 = vmul.f32 1.442695, %v822_v28 }
 0x352   :  { %v956_v31 = vpop.permute.xlu0 %955  ;;  %v845_v32 = vsel %vm176_vm2, %v4384_v29, 0.0  ;;  %v1032_v43 = vpop.permute.xlu1 %1031 }
 0x353   :  { %4393 = vpow2.f32 %v837_v30  ;;  %846 = vadd.xlane.f32.xlu1 %v845_v32  ;;  %4079 = vmatpush3.msra.mxu1 %v956_v31 }
 0x354   :  { %4088 = vmatprep.subr.mxu1 %v4514_v10 }
 0x355   :  { %v4386_v33 = vpop.eup %4385 }
 0x356   :  { %v4388_v34 = vpop.eup %4387  ;;  %v851_v35 = vsel %vm176_vm2, %v4386_v33, 0.0  ;;  %v1108_v44 = vpop.permute.xlu1 %1107 }
 0x357   :  { %852 = vadd.xlane.f32.xlu1 %v851_v35  ;;  %v848_v36 = vsel %vm176_vm2, %v4388_v34, 0.0  ;;  %v1184_v45 = vpop.permute.xlu0 %1183 }
 0x358   :  { %849 = vadd.xlane.f32.xlu0 %v848_v36 }
 0x359   :  { %v4390_v37 = vpop.eup %4389 }
 0x35a   :  { %v4392_v38 = vpop.eup %4391  ;;  %v857_v39 = vsel %vm176_vm2, %v4390_v37, 0.0  ;;  %v1260_v46 = vpop.permute.xlu1 %1259 }
 0x35b   :  { %858 = vadd.xlane.f32.xlu1 %v857_v39  ;;  %v854_v40 = vsel %vm176_vm2, %v4392_v38, 0.0 }
 0x35c   :  { %855 = vadd.xlane.f32.xlu0 %v854_v40 }
 0x35d   :  { %v4775_v41 = vpop.eup %4393 }
 0x35e   :  { %v860_v42 = vsel %vm176_vm2, %v4775_v41, 0.0 }
 0x360   :  { %861 = vadd.xlane.f32.xlu0 %v860_v42 }
 0x36c   :  { %1411 = vrot.lane.b32.xlu1 %v4688_v19, %s4520_s17 }
 0x376   :  { %1335 = vrot.lane.b32.xlu0 %v4682_v18, %s4520_s17 }
 0x387   :  { %v844_v47 = vpop.xlane.xlu0 %843 }
 0x388   :  { %4395 = vrcp.f32 %v844_v47 }
 0x38b   :  { %v841_v48 = vpop.xlane.xlu1 %840 }
 0x38c   :  { %4397 = vrcp.f32 %v841_v48 }
 0x392   :  { %v4396_v49 = vpop.eup %4395 }
 0x393   :  { %v872_v50 = vmul.f32 %v4396_v49, %v4760_v2 }
 0x395   :  { %4081 = vmatmul.mubr.msk.f32.vlgmr.msra.gmra.mrb[12].mxu1 %vm176_vm2, %v872_v50 }
 0x396   :  { %v4398_v51 = vpop.eup %4397  ;;  %4089 = vmatpush3.msra.mxu1 %v1108_v44  ;;  %4090 = vmatprep.mubr.msk.f32.mxu1 %vm4517_vm1, %v4514_v10 }
 0x397   :  { %v871_v18 = vmul.f32 %v4398_v51, %v4764_v4  ;;  %4098 = vmatprep.subr.mxu1 %v4514_v10 }
 0x399   :  { %4076 = vmatmul.mubr.msk.f32.vlgmr.msra.gmra.mrb[6].mxu0 %vm176_vm2, %v871_v18 }
 0x39a   :  { %4084 = vmatpush3.msra.mxu0 %v1032_v43  ;;  %4085 = vmatprep.mubr.msk.f32.mxu0 %vm4517_vm1, %v4514_v10 }
 0x39b   :  { %4093 = vmatprep.subr.mxu0 %v4514_v10 }
 0x3e0   :  { %v847_v19 = vpop.xlane.xlu1 %846 }
 0x3e1   :  { %4399 = vrcp.f32 %v847_v19 }
 0x3e4   :  { %v853_v52 = vpop.xlane.xlu1 %852 }
 0x3e5   :  { %4401 = vrcp.f32 %v853_v52  ;;  %v850_v53 = vpop.xlane.xlu0 %849 }
 0x3e6   :  { %4403 = vrcp.f32 %v850_v53 }
 0x3e8   :  { %v859_v54 = vpop.xlane.xlu1 %858 }
 0x3e9   :  { %4405 = vrcp.f32 %v859_v54  ;;  %v856_v55 = vpop.xlane.xlu0 %855 }
 0x3ea   :  { %4407 = vrcp.f32 %v856_v55 }
 0x3eb   :  { %v4400_v56 = vpop.eup %4399 }
 0x3ec   :  { %v873_v57 = vmul.f32 %v4400_v56, %v4384_v29  ;;  %v1412_v4 = vpop.permute.xlu1 %1411 }
 0x3ed   :  { %v862_v58 = vpop.xlane.xlu0 %861 }
 0x3ee   :  { %4409 = vrcp.f32 %v862_v58  ;;  %4086 = vmatmul.mubr.msk.f32.vlgmr.msra.gmra.mrb[8].mxu0 %vm176_vm2, %v873_v57 }
 0x3ef   :  { %v4402_v59 = vpop.eup %4401  ;;  %4094 = vmatpush3.msra.mxu0 %v1184_v45  ;;  %4095 = vmatprep.mubr.msk.f32.mxu0 %vm4517_vm1, %v4514_v10 }
 0x3f0   :  { %v4404_v60 = vpop.eup %4403  ;;  %v875_v61 = vmul.f32 %v4402_v59, %v4386_v33  ;;  %4103 = vmatprep.subr.mxu0 %v4514_v10 }
 0x3f1   :  { %v874_v62 = vmul.f32 %v4404_v60, %v4388_v34  ;;  %v1336_v63 = vpop.permute.xlu0 %1335 }
 0x3f2   :  { %4096 = vmatmul.mubr.msk.f32.vlgmr.msra.gmra.mrb[10].mxu0 %vm176_vm2, %v875_v61 }
 0x3f3   :  { %v4406_v0 = vpop.eup %4405  ;;  %4091 = vmatmul.mubr.msk.f32.vlgmr.msra.gmra.mrb[14].mxu1 %vm176_vm2, %v874_v62  ;;  %4104 = vmatpush3.msra.mxu0 %v1336_v63  ;;  %v1659_v62 = vld [vmem:[%s5229_s7 + $0x8] sm:$0xff] }
 0x3f4   :  { %v4408_v1 = vpop.eup %4407  ;;  %v877_v2 = vmul.f32 %v4406_v0, %v4390_v37  ;;  %4099 = vmatpush3.msra.mxu1 %v1260_v46  ;;  %4100 = vmatprep.mubr.msk.f32.mxu1 %vm4517_vm1, %v4514_v10  ;;  %v3819_v46 = vld [vmem:[%s5226_s4] ss:$0 sm:$0xff]  ;;  %v1660_v0 = vld [vmem:[%s5229_s7 + $0x10] sm:$0xff] }
 0x3f5   :  { %v876_v3 = vmul.f32 %v4408_v1, %v4392_v38  ;;  %4105 = vmatprep.mubr.msk.f32.mxu0 %vm4517_vm1, %v4514_v10  ;;  %4108 = vmatprep.subr.mxu1 %v4514_v10  ;;  %v1661_v1 = vld [vmem:[%s5229_s7 + $0x18] sm:$0xff] }
 0x3f6   :  { %4106 = vmatmul.mubr.msk.f32.vlgmr.msra.gmra.mrb[12].mxu0 %vm176_vm2, %v877_v2  ;;  %4295 = vmatprep.subr.bf16.mxu0 %v4294_v16  ;;  %v4306_v2 = vpack.c.bf16 %v1661_v1, %v1660_v0 }
 0x3f7   :  { %4101 = vmatmul.mubr.msk.f32.vlgmr.msra.gmra.mrb[16].mxu1 %vm176_vm2, %v876_v3  ;;  %4297 = vmatpush3.bf16.msra.mxu0 %v4294_v16  ;;  %v1752_v3 = vld [vmem:[%s5231_s9] sm:$0xff] }
 0x3f8   :  { %v4410_v6 = vpop.eup %4409  ;;  %4109 = vmatpush3.msra.mxu1 %v1412_v4  ;;  %4110 = vmatprep.mubr.msk.f32.mxu1 %vm4517_vm1, %v4514_v10  ;;  %v1753_v4 = vld [vmem:[%s5231_s9 + $0x8] sm:$0xff] }
 0x3f9   :  { %v878_v8 = vmul.f32 %v4410_v6, %v4775_v41  ;;  %4299 = vmatprep.subr.bf16.mxu0 %v4298_v21  ;;  %v1754_v6 = vld [vmem:[%s5231_s9 + $0x10] sm:$0xff] }
 0x3fb   :  { %4111 = vmatmul.mubr.msk.f32.vlgmr.msra.gmra.mrb[18].mxu1 %vm176_vm2, %v878_v8  ;;  %4301 = vmatpush3.bf16.msra.mxu0 %v4298_v21  ;;  %v4310_v8 = vpack.c.bf16 %v1753_v4, %v1752_v3 }
 0x3fd   :  { %4311 = vmatprep.subr.bf16.mxu0 %v4310_v8 }
 0x468   :  { %v1027_v9 = vpop.f32.mrb[12].mxu1 }
 0x469   :  { %v4082_v11 = vpop.f32.mrb[13].mxu1 }
 0x46c   :  { %v951_v12 = vpop.f32.mrb[6].mxu0 }
 0x46d   :  { %v4077_v13 = vpop.f32.mrb[7].mxu0 }
 0x46e   :  { %v1757_v13 = vld [vmem:[%s5231_s9 + $0x28] sm:$0xff] }
 0x4c1   :  { %v1103_v22 = vpop.f32.mrb[8].mxu0 }
 0x4c2   :  { %v4087_v23 = vpop.f32.mrb[9].mxu0  ;;  %1489 = vrot.lane.b32.xlu0 %v1103_v22, %s4513_s29 }
 0x4c5   :  { %v1255_v24 = vpop.f32.mrb[10].mxu0 }
 0x4c6   :  { %v1179_v25 = vpop.f32.mrb[14].mxu1  ;;  %1497 = vrot.lane.b32.xlu0 %v1255_v24, %s5241_s19  ;;  %v4097_v26 = vpop.f32.mrb[11].mxu0  ;;  %v3822_v24 = vld [vmem:[%s5227_s5] ss:$0 sm:$0xff] }
 0x4c7   :  { %1491 = vrot.lane.b32.xlu1 %v1179_v25, %s4513_s29  ;;  %v4092_v27 = vpop.f32.mrb[15].mxu1  ;;  %v3823_v26 = vld [vmem:[%s5228_s6] ss:$0 sm:$0xff] }
 0x4c9   :  { %v1407_v28 = vpop.f32.mrb[12].mxu0 }
 0x4ca   :  { %v1331_v29 = vpop.f32.mrb[16].mxu1  ;;  %1505 = vrot.lane.b32.xlu0 %v1407_v28, %s5239_s18  ;;  %v4107_v30 = vpop.f32.mrb[13].mxu0 }
 0x4cb   :  { %1499 = vrot.lane.b32.xlu1 %v1331_v29, %s5241_s19  ;;  %v4102_v31 = vpop.f32.mrb[17].mxu1 }
 0x4ce   :  { %v1483_v32 = vpop.f32.mrb[18].mxu1 }
 0x4cf   :  { %1507 = vrot.lane.b32.xlu1 %v1483_v32, %s5239_s18  ;;  %v4112_v33 = vpop.f32.mrb[19].mxu1 }
 0x4d0   :  { %v1758_v33 = vld [vmem:[%s5231_s9 + $0x30] sm:$0xff] }
 0x534   :  { %v1490_v34 = vpop.permute.xlu0 %1489 }
 0x535   :  { %v1511_v37 = vsel %vm176_vm2, %v951_v12, %v1490_v34  ;;  %v1756_v12 = vld [vmem:[%s5231_s9 + $0x20] sm:$0xff]  ;;  %v1759_v34 = vld [vmem:[%s5231_s9 + $0x38] sm:$0xff] }
 0x536   :  { %v4318_v14 = vpack.c.bf16 %v1757_v13, %v1756_v12 }
 0x538   :  { %v1498_v35 = vpop.permute.xlu0 %1497 }
 0x539   :  { %v1492_v36 = vpop.permute.xlu1 %1491  ;;  %v1514_v38 = vsel %vm1513_vm3, %v1511_v37, %v1498_v35  ;;  %v4322_v35 = vpack.c.bf16 %v1759_v34, %v1758_v33 }
 0x53a   :  { %v1512_v42 = vsel %vm176_vm2, %v1027_v9, %v1492_v36  ;;  %v1755_v9 = vld [vmem:[%s5231_s9 + $0x18] sm:$0xff]  ;;  %v3824_v36 = vld [vmem:[%s5230_s8] ss:$0 sm:$0xff] }
 0x53b   :  { %v4314_v11 = vpack.c.bf16 %v1755_v9, %v1754_v6  ;;  %v3830_v9 = vld [vmem:[%s5233_s11] ss:$0 sm:$0xff] }
 0x53c   :  { %v1506_v39 = vpop.permute.xlu0 %1505 }
 0x53d   :  { %v1500_v40 = vpop.permute.xlu1 %1499  ;;  %v1517_v41 = vsel %vm1516_vm4, %v1514_v38, %v1506_v39 }
 0x53e   :  { %4121 = vmatprep.mubr.msk.f32.mxu0 %vm78_vm0, %v1517_v41  ;;  %v1515_v43 = vsel %vm1513_vm3, %v1512_v42, %v1500_v40 }
 0x541   :  { %v1508_v44 = vpop.permute.xlu1 %1507 }
 0x542   :  { %v1518_v45 = vsel %vm1516_vm4, %v1515_v43, %v1508_v44  ;;  %v3827_v43 = vld [vmem:[%s5232_s10] ss:$0 sm:$0xff] }
 0x543   :  { %4122 = vmatmul.mubr.msk.f32.vlgmr.msra.gmra.mrb[14].mxu0 %vm78_vm0, %v1518_v45 }
 0x544   :  { %4313 = vmatpush3.bf16.msra.mxu0 %v4310_v8 }
 0x545   :  { %4315 = vmatprep.subr.bf16.mxu0 %v4314_v11 }
 0x548   :  { %4317 = vmatpush3.bf16.msra.mxu0 %v4314_v11 }
 0x549   :  { %4319 = vmatprep.subr.bf16.mxu0 %v4318_v14 }
 0x54c   :  { %4321 = vmatpush3.bf16.msra.mxu0 %v4318_v14  ;;  %v3831_v14 = vld [vmem:[%s5234_s12] ss:$0 sm:$0xff] }
 0x54d   :  { %4323 = vmatprep.subr.bf16.mxu0 %v4322_v35 }
 0x550   :  { %4325 = vmatpush3.bf16.msra.mxu0 %v4322_v35 }
 0x551   :  { %4175 = vmatprep.subr.mxu0 %v4514_v10 }
 0x616   :  { %v4123_v47 = vpop.f32.mrb[14].mxu0 }
 0x617   :  { %v1608_v48 = vadd.f32 %v4123_v47, %v3819_v46  ;;  %v1602_v49 = vpop.f32.mrb[15].mxu0 }
 0x618   :  { %v1603_v50 = vadd.f32 %v3819_v46, %v1602_v49 }
 0x619   :  { %v1612_v51 = vadd.f32 %v1608_v48, %v4635_v7 }
 0x61a   :  { %v1611_v18 = vadd.f32 %v1603_v50, %v4631_v5  ;;  %v1658_v5 = vld [vmem:[%s5229_s7] sm:$0xff] }
 0x61b   :  { %v1618_v19 = vsel %vm78_vm0, %v1612_v51, 0.0  ;;  %v4302_v63 = vpack.c.bf16 %v1659_v62, %v1658_v5  ;;  %v3834_v5 = vld [vmem:[%s5223_s1 + $0x30] sm:$0xff]  ;;  %v3835_v62 = vld [vmem:[%s5223_s1 + $0x38] sm:$0xff] }
 0x61c   :  { %1619 = vadd.xlane.f32.xlu1 %v1618_v19  ;;  %v1615_v52 = vsel %vm78_vm0, %v1611_v18, 0.0 }
 0x61d   :  { %1616 = vadd.xlane.f32.xlu0 %v1615_v52  ;;  %4303 = vmatprep.subr.bf16.mxu1 %v4302_v63 }
 0x61e   :  { %4305 = vmatpush3.bf16.msra.mxu1 %v4302_v63  ;;  %v4330_v63 = vpack.c.bf16 %v3835_v62, %v3834_v5 }
 0x61f   :  { %4307 = vmatprep.subr.bf16.mxu1 %v4306_v2 }
 0x622   :  { %4309 = vmatpush3.bf16.msra.mxu1 %v4306_v2 }
 0x6a9   :  { %v1620_v53 = vpop.xlane.xlu1 %1619 }
 0x6aa   :  { %v1623_v54 = vmul.f32 0.03125, %v1620_v53  ;;  %v1617_v55 = vpop.xlane.xlu0 %1616 }
 0x6ab   :  { %v1622_v56 = vmul.f32 0.03125, %v1617_v55 }
 0x6ac   :  { %v1625_v57 = vsub.f32 %v1612_v51, %v1623_v54 }
 0x6ad   :  { %v1624_v58 = vsub.f32 %v1611_v18, %v1622_v56 }
 0x6ae   :  { %v1627_v61 = vmul.f32 %v1625_v57, %v1625_v57 }
 0x6af   :  { %v1626_v59 = vmul.f32 %v1624_v58, %v1624_v58 }
 0x6b0   :  { %v1631_v7 = vsel %vm78_vm0, %v1627_v61, 0.0  ;;  %v3833_v61 = vld [vmem:[%s5223_s1 + $0x28] sm:$0xff] }
 0x6b1   :  { %v1628_v60 = vsel %vm78_vm0, %v1626_v59, 0.0 }
 0x6b2   :  { %1629 = vadd.xlane.f32.xlu0 %v1628_v60  ;;  %v3832_v60 = vld [vmem:[%s5223_s1 + $0x20] sm:$0xff] }
 0x6b6   :  { %1632 = vadd.xlane.f32.xlu0 %v1631_v7  ;;  %v4326_v7 = vpack.c.bf16 %v3833_v61, %v3832_v60 }
 0x6b8   :  { %4327 = vmatprep.subr.bf16.mxu1 %v4326_v7 }
 0x73f   :  { %v1630_v15 = vpop.xlane.xlu0 %1629 }
 0x740   :  { %v1634_v16 = vmul.f32 0.03125, %v1630_v15 }
 0x742   :  { %v1636_v17 = vadd.f32 1e-05, %v1634_v16 }
 0x743   :  { %v1633_v20 = vpop.xlane.xlu0 %1632 }
 0x744   :  { %4411 = vrsqrt.f32 %v1636_v17  ;;  %v1635_v21 = vmul.f32 0.03125, %v1633_v20 }
 0x746   :  { %v1637_v22 = vadd.f32 1e-05, %v1635_v21  ;;  %v3837_v21 = vld [vmem:[%s5224_s2 + $0x1] ss:$0 sm:$0xff] }
 0x748   :  { %4413 = vrsqrt.f32 %v1637_v22 }
 0x74e   :  { %v4412_v23 = vpop.eup %4411 }
 0x74f   :  { %v1640_v25 = vmul.f32 %v4412_v23, %v1624_v58 }
 0x751   :  { %v1648_v27 = vmul.f32 %v3822_v24, %v1640_v25 }
 0x752   :  { %v4414_v28 = vpop.eup %4413 }
 0x753   :  { %v1641_v29 = vmul.f32 %v4414_v28, %v1625_v57  ;;  %v1656_v30 = vadd.f32 %v3823_v26, %v1648_v27 }
 0x755   :  { %v1649_v31 = vmul.f32 %v3822_v24, %v1641_v29  ;;  %4132 = vmatprep.mubr.msk.f32.mxu1 %vm78_vm0, %v1656_v30 }
 0x757   :  { %v1657_v32 = vadd.f32 %v3823_v26, %v1649_v31 }
 0x759   :  { %4133 = vmatmul.mubr.msk.f32.vlgmr.msra.gmra.mrb[20].mxu1 %vm78_vm0, %v1657_v32 }
 0x75a   :  { %4329 = vmatpush3.bf16.msra.mxu1 %v4326_v7 }
 0x75b   :  { %4331 = vmatprep.subr.bf16.mxu1 %v4330_v63 }
 0x75e   :  { %4333 = vmatpush3.bf16.msra.mxu1 %v4330_v63 }
 0x75f   :  { %4165 = vmatprep.subr.mxu1 %v4514_v10 }
 0x82c   :  { %v4134_v37 = vpop.f32.mrb[20].mxu1 }
 0x82d   :  { %v1747_v38 = vadd.f32 %v4134_v37, %v3824_v36  ;;  %v1741_v39 = vpop.f32.mrb[21].mxu1 }
 0x82e   :  { %v1742_v40 = vadd.f32 %v3824_v36, %v1741_v39 }
 0x82f   :  { %v1751_v42 = vmax.f32 %v1747_v38, 0.0 }
 0x830   :  { %v1750_v41 = vmax.f32 %v1742_v40, 0.0 }
 0x832   :  { %4151 = vmatprep.mubr.msk.f32.mxu0 %vm1767_vm5, %v1750_v41 }
 0x833   :  { %4152 = vmatmul.mubr.msk.f32.vlgmr.msra.gmra.mrb[16].mxu0 %vm1767_vm5, %v1751_v42 }
 0x834   :  { %4177 = vmatprep.mubr.msk.f32.mxu0 %vm4517_vm1, %v4514_v10 }
 0x906   :  { %v4153_v44 = vpop.f32.mrb[16].mxu0 }
 0x907   :  { %v1846_v45 = vadd.f32 %v4153_v44, %v3827_v43  ;;  %v1840_v46 = vpop.f32.mrb[17].mxu0 }
 0x908   :  { %v1841_v47 = vadd.f32 %v3827_v43, %v1840_v46 }
 0x909   :  { %v1850_v48 = vadd.f32 %v1846_v45, %v1657_v32 }
 0x90a   :  { %v1849_v49 = vadd.f32 %v1841_v47, %v1656_v30 }
 0x90b   :  { %v1856_v50 = vsel %vm78_vm0, %v1850_v48, 0.0 }
 0x90c   :  { %1857 = vadd.xlane.f32.xlu0 %v1856_v50  ;;  %v1853_v51 = vsel %vm78_vm0, %v1849_v49, 0.0 }
 0x90d   :  { %1854 = vadd.xlane.f32.xlu1 %v1853_v51 }
 0x999   :  { %v1858_v18 = vpop.xlane.xlu0 %1857 }
 0x99a   :  { %v1860_v19 = vmul.f32 0.03125, %v1858_v18  ;;  %v1855_v52 = vpop.xlane.xlu1 %1854 }
 0x99b   :  { %v1859_v53 = vmul.f32 0.03125, %v1855_v52 }
 0x99c   :  { %v1862_v54 = vsub.f32 %v1850_v48, %v1860_v19 }
 0x99d   :  { %v1861_v55 = vsub.f32 %v1849_v49, %v1859_v53 }
 0x99e   :  { %v1864_v56 = vmul.f32 %v1862_v54, %v1862_v54 }
 0x99f   :  { %v1863_v57 = vmul.f32 %v1861_v55, %v1861_v55 }
 0x9a0   :  { %v1868_v58 = vsel %vm78_vm0, %v1864_v56, 0.0 }
 0x9a1   :  { %1869 = vadd.xlane.f32.xlu0 %v1868_v58  ;;  %v1865_v59 = vsel %vm78_vm0, %v1863_v57, 0.0 }
 0x9a2   :  { %1866 = vadd.xlane.f32.xlu1 %v1865_v59 }
 0xa2e   :  { %v1870_v0 = vpop.xlane.xlu0 %1869 }
 0xa2f   :  { %v1872_v1 = vmul.f32 0.03125, %v1870_v0  ;;  %v1867_v2 = vpop.xlane.xlu1 %1866 }
 0xa30   :  { %v1871_v3 = vmul.f32 0.03125, %v1867_v2 }
 0xa31   :  { %v1874_v4 = vadd.f32 1e-05, %v1872_v1 }
 0xa32   :  { %v1873_v6 = vadd.f32 1e-05, %v1871_v3 }
 0xa33   :  { %4415 = vrsqrt.f32 %v1874_v4 }
 0xa34   :  { %4417 = vrsqrt.f32 %v1873_v6 }
 0xa3d   :  { %v4416_v8 = vpop.eup %4415 }
 0xa3e   :  { %v4418_v11 = vpop.eup %4417  ;;  %v1878_v12 = vmul.f32 %v4416_v8, %v1862_v54 }
 0xa3f   :  { %v1877_v13 = vmul.f32 %v4418_v11, %v1861_v55 }
 0xa40   :  { %v1886_v15 = vmul.f32 %v3830_v9, %v1878_v12 }
 0xa41   :  { %v1885_v16 = vmul.f32 %v3830_v9, %v1877_v13 }
 0xa42   :  { %v4925_v20 = vadd.f32 %v3831_v14, %v1886_v15 }
 0xa43   :  { %v4923_v17 = vadd.f32 %v3831_v14, %v1885_v16 }
 0xa45   :  { %4162 = vmatprep.mubr.msk.f32.mxu1 %vm78_vm0, %v4923_v17 }
 0xa46   :  { %4163 = vmatmul.mubr.msk.f32.vlgmr.msra.gmra.mrb[22].mxu1 %vm78_vm0, %v4925_v20 }
 0xa47   :  { %4167 = vmatprep.mubr.msk.f32.mxu1 %vm4517_vm1, %v4514_v10 }
 0xb19   :  { %v4164_v22 = vpop.f32.mrb[22].mxu1 }
 0xb1a   :  { %v4936_v23 = vadd.f32 %v4164_v22, %v3837_v21  ;;  %v1980_v24 = vpop.f32.mrb[23].mxu1 }
 0xb1b   :  { %v4938_v25 = vadd.f32 %v3837_v21, %v1980_v24 }
 0xb1c   :  { %1993 = vrot.lane.b32.xlu0 %v4936_v23, %s4516_s27 }
 0xb1d   :  { %1991 = vrot.lane.b32.xlu1 %v4938_v25, %s4516_s27 }
 0xb20   :  { %1999 = vrot.lane.b32.xlu0 %v4938_v25, %s4518_s30 }
 0xb21   :  { %1995 = vrot.lane.b32.xlu1 %v4938_v25, %s4515_s26 }
 0xb24   :  { %2003 = vrot.lane.b32.xlu0 %v4938_v25, %s4519_s16 }
 0xb25   :  { %1997 = vrot.lane.b32.xlu1 %v4936_v23, %s4515_s26 }
 0xb29   :  { %2001 = vrot.lane.b32.xlu1 %v4936_v23, %s4518_s30 }
 0xb2d   :  { %2079 = vrot.lane.b32.xlu1 %v4936_v23, %s4519_s16 }
 0xb8e   :  { %v4956_v26 = vpop.permute.xlu0 %1993 }
 0xb8f   :  { %2231 = vrot.lane.b32.xlu1 %v4956_v26, %s4519_s16  ;;  %v4960_v27 = vpop.permute.xlu1 %1991 }
 0xb90   :  { %2155 = vrot.lane.b32.xlu0 %v4960_v27, %s4519_s16 }
 0xb92   :  { %v4964_v28 = vpop.permute.xlu0 %1999 }
 0xb93   :  { %v4966_v29 = vpop.permute.xlu1 %1995 }
 0xb94   :  { %2307 = vrot.lane.b32.xlu0 %v4966_v29, %s4519_s16 }
 0xb96   :  { %v2004_v30 = vpop.permute.xlu0 %2003 }
 0xb97   :  { %4166 = vmatpush3.xpose.msk.msra.mxu1 %vm176_vm2, %v2004_v30  ;;  %v4971_v31 = vpop.permute.xlu1 %1997 }
 0xb98   :  { %2459 = vrot.lane.b32.xlu0 %v4964_v28, %s4519_s16  ;;  %2383 = vrot.lane.b32.xlu1 %v4971_v31, %s4519_s16 }
 0xb99   :  { %4170 = vmatprep.subr.mxu1 %v4514_v10 }
 0xb9a   :  { %4168 = vmatmul.mubr.msk.f32.vlgmr.msra.gmra.mrb[24].mxu1 %vm176_vm2, %v4938_v25 }
 0xb9b   :  { %v4980_v32 = vpop.permute.xlu1 %2001  ;;  %4172 = vmatprep.mubr.msk.f32.mxu1 %vm4517_vm1, %v4514_v10 }
 0xb9c   :  { %2535 = vrot.lane.b32.xlu1 %v4980_v32, %s4519_s16 }
 0xb9f   :  { %v2080_v33 = vpop.permute.xlu1 %2079 }
 0xba0   :  { %4171 = vmatpush3.xpose.msk.msra.mxu1 %vm176_vm2, %v2080_v33 }
 0xba1   :  { %4180 = vmatprep.subr.mxu1 %v4514_v10 }
 0xba3   :  { %4173 = vmatmul.mubr.msk.f32.vlgmr.msra.gmra.mrb[26].mxu1 %vm176_vm2, %v4936_v23 }
 0xba4   :  { %4182 = vmatprep.mubr.msk.f32.mxu1 %vm4517_vm1, %v4514_v10 }
 0xc01   :  { %v2232_v34 = vpop.permute.xlu1 %2231 }
 0xc02   :  { %v2156_v35 = vpop.permute.xlu0 %2155  ;;  %4181 = vmatpush3.xpose.msk.msra.mxu1 %vm176_vm2, %v2232_v34 }
 0xc03   :  { %4176 = vmatpush3.xpose.msk.msra.mxu0 %vm176_vm2, %v2156_v35  ;;  %4190 = vmatprep.subr.mxu1 %v4514_v10 }
 0xc04   :  { %4185 = vmatprep.subr.mxu0 %v4514_v10 }
 0xc05   :  { %4183 = vmatmul.mubr.msk.f32.vlgmr.msra.gmra.mrb[28].mxu1 %vm176_vm2, %v4956_v26 }
 0xc06   :  { %4178 = vmatmul.mubr.msk.f32.vlgmr.msra.gmra.mrb[18].mxu0 %vm176_vm2, %v4960_v27  ;;  %v2308_v36 = vpop.permute.xlu0 %2307  ;;  %4192 = vmatprep.mubr.msk.f32.mxu1 %vm4517_vm1, %v4514_v10 }
 0xc07   :  { %4186 = vmatpush3.xpose.msk.msra.mxu0 %vm176_vm2, %v2308_v36  ;;  %4187 = vmatprep.mubr.msk.f32.mxu0 %vm4517_vm1, %v4514_v10 }
 0xc08   :  { %4195 = vmatprep.subr.mxu0 %v4514_v10 }
 0xc0a   :  { %4188 = vmatmul.mubr.msk.f32.vlgmr.msra.gmra.mrb[20].mxu0 %vm176_vm2, %v4966_v29  ;;  %v2460_v37 = vpop.permute.xlu0 %2459  ;;  %v2384_v38 = vpop.permute.xlu1 %2383 }
 0xc0b   :  { %4191 = vmatpush3.xpose.msk.msra.mxu1 %vm176_vm2, %v2384_v38  ;;  %4196 = vmatpush3.xpose.msk.msra.mxu0 %vm176_vm2, %v2460_v37 }
 0xc0c   :  { %4197 = vmatprep.mubr.msk.f32.mxu0 %vm4517_vm1, %v4514_v10  ;;  %4200 = vmatprep.subr.mxu1 %v4514_v10 }
 0xc0d   :  { %4205 = vmatprep.subr.mxu0 %v4514_v10 }
 0xc0e   :  { %4193 = vmatmul.mubr.msk.f32.vlgmr.msra.gmra.mrb[30].mxu1 %vm176_vm2, %v4971_v31  ;;  %4198 = vmatmul.mubr.msk.f32.vlgmr.msra.gmra.mrb[22].mxu0 %vm176_vm2, %v4964_v28  ;;  %v2536_v39 = vpop.permute.xlu1 %2535 }
 0xc0f   :  { %4201 = vmatpush3.xpose.msk.msra.mxu1 %vm176_vm2, %v2536_v39  ;;  %4202 = vmatprep.mubr.msk.f32.mxu1 %vm4517_vm1, %v4514_v10 }
 0xc10   :  { %4210 = vmatprep.subr.mxu1 %v4514_v10  ;;  %4207 = vmatprep.mubr.msk.f32.mxu0 %vm4517_vm1, %v4514_v10 }
 0xc12   :  { %4203 = vmatmul.mubr.msk.f32.vlgmr.msra.gmra.mrb[32].mxu1 %vm176_vm2, %v4980_v32 }
 0xc13   :  { %4212 = vmatprep.mubr.msk.f32.mxu1 %vm4517_vm1, %v4514_v10 }
 0xc6d   :  { %v2075_v40 = vpop.f32.mrb[24].mxu1 }
 0xc6e   :  { %v2611_v41 = vmul.f32 0.35355338, %v2075_v40  ;;  %v4169_v42 = vpop.f32.mrb[25].mxu1 }
 0xc70   :  { %v2619_v43 = vsel %vm176_vm2, %v2611_v41, -inf }
 0xc71   :  { %2620 = vmax.xlane.f32.xlu0 %v2619_v43 }
 0xc76   :  { %v2151_v44 = vpop.f32.mrb[26].mxu1 }
 0xc77   :  { %v2612_v45 = vmul.f32 0.35355338, %v2151_v44  ;;  %v4174_v46 = vpop.f32.mrb[27].mxu1 }
 0xc79   :  { %v2622_v47 = vsel %vm176_vm2, %v2612_v45, -inf }
 0xc7a   :  { %2623 = vmax.xlane.f32.xlu1 %v2622_v47 }
 0xcd8   :  { %v2303_v48 = vpop.f32.mrb[28].mxu1 }
 0xcd9   :  { %v2227_v49 = vpop.f32.mrb[18].mxu0  ;;  %v4184_v50 = vpop.f32.mrb[29].mxu1  ;;  %v2614_v19 = vmul.f32 0.35355338, %v2303_v48 }
 0xcda   :  { %v2613_v51 = vmul.f32 0.35355338, %v2227_v49  ;;  %v4179_v18 = vpop.f32.mrb[19].mxu0 }
 0xcdb   :  { %v2628_v57 = vsel %vm176_vm2, %v2614_v19, -inf }
 0xcdc   :  { %v2625_v52 = vsel %vm176_vm2, %v2613_v51, -inf }
 0xcdd   :  { %2626 = vmax.xlane.f32.xlu0 %v2625_v52  ;;  %v2379_v53 = vpop.f32.mrb[20].mxu0 }
 0xcde   :  { %v2615_v54 = vmul.f32 0.35355338, %v2379_v53  ;;  %v4189_v55 = vpop.f32.mrb[21].mxu0 }
 0xce0   :  { %v2631_v56 = vsel %vm176_vm2, %v2615_v54, -inf }
 0xce1   :  { %v2531_v58 = vpop.f32.mrb[22].mxu0  ;;  %2632 = vmax.xlane.f32.xlu1 %v2631_v56  ;;  %2629 = vmax.xlane.f32.xlu0 %v2628_v57  ;;  %v2455_v59 = vpop.f32.mrb[30].mxu1 }
 0xce2   :  { %v2617_v60 = vmul.f32 0.35355338, %v2531_v58  ;;  %v2616_v61 = vmul.f32 0.35355338, %v2455_v59  ;;  %v4194_v7 = vpop.f32.mrb[31].mxu1  ;;  %v4199_v5 = vpop.f32.mrb[23].mxu0 }
 0xce4   :  { %v2637_v62 = vsel %vm176_vm2, %v2617_v60, -inf  ;;  %v2634_v63 = vsel %vm176_vm2, %v2616_v61, -inf }
 0xce5   :  { %2638 = vmax.xlane.f32.xlu1 %v2637_v62  ;;  %2635 = vmax.xlane.f32.xlu0 %v2634_v63  ;;  %v2607_v0 = vpop.f32.mrb[32].mxu1 }
 0xce6   :  { %v2618_v1 = vmul.f32 0.35355338, %v2607_v0  ;;  %v4204_v2 = vpop.f32.mrb[33].mxu1 }
 0xce8   :  { %v2640_v3 = vsel %vm176_vm2, %v2618_v1, -inf }
 0xce9   :  { %2641 = vmax.xlane.f32.xlu0 %v2640_v3 }
 0xcf6   :  { %2707 = vrot.lane.b32.xlu1 %v4938_v25, %s4520_s17 }
 0xcfa   :  { %2859 = vrot.lane.b32.xlu1 %v4960_v27, %s4520_s17 }
 0xcfe   :  { %2935 = vrot.lane.b32.xlu1 %v4956_v26, %s4520_s17  ;;  %v2621_v8 = vpop.xlane.xlu0 %2620 }
 0xcff   :  { %2783 = vrot.lane.b32.xlu0 %v4936_v23, %s4520_s17  ;;  %v2643_v9 = vsub.f32 %v2611_v41, %v2621_v8 }
 0xd01   :  { %v2651_v12 = vmul.f32 1.442695, %v2643_v9 }
 0xd02   :  { %3087 = vrot.lane.b32.xlu1 %v4971_v31, %s4520_s17 }
 0xd03   :  { %3011 = vrot.lane.b32.xlu0 %v4966_v29, %s4520_s17 }
 0xd07   :  { %v2624_v4 = vpop.xlane.xlu1 %2623 }
 0xd08   :  { %v2644_v6 = vsub.f32 %v2612_v45, %v2624_v4 }
 0xd0a   :  { %v2653_v11 = vmul.f32 1.442695, %v2644_v6 }
 0xd0c   :  { %4419 = vpow2.f32 %v2653_v11 }
 0xd0d   :  { %4421 = vpow2.f32 %v2651_v12 }
 0xd16   :  { %v5048_v13 = vpop.eup %4419 }
 0xd17   :  { %v2670_v14 = vsel %vm176_vm2, %v5048_v13, 0.0  ;;  %v5052_v15 = vpop.eup %4421 }
 0xd18   :  { %v2667_v16 = vsel %vm176_vm2, %v5052_v15, 0.0 }
 0xd22   :  { %2671 = vadd.xlane.f32.xlu0 %v2670_v14 }
 0xd26   :  { %2668 = vadd.xlane.f32.xlu1 %v2667_v16 }
 0xd6a   :  { %v2627_v21 = vpop.xlane.xlu0 %2626 }
 0xd6b   :  { %v2645_v22 = vsub.f32 %v2613_v51, %v2627_v21 }
 0xd6d   :  { %v2655_v23 = vmul.f32 1.442695, %v2645_v22 }
 0xd6e   :  { %v2630_v24 = vpop.xlane.xlu0 %2629  ;;  %v2633_v25 = vpop.xlane.xlu1 %2632 }
 0xd6f   :  { %4423 = vpow2.f32 %v2655_v23  ;;  %v2646_v26 = vsub.f32 %v2614_v19, %v2630_v24  ;;  %v2647_v27 = vsub.f32 %v2615_v54, %v2633_v25 }
 0xd71   :  { %v2657_v29 = vmul.f32 1.442695, %v2646_v26  ;;  %v2659_v30 = vmul.f32 1.442695, %v2647_v27  ;;  %v3864_v26 = vld [vmem:[%s5225_s3 + $0x20] sm:$0xff]  ;;  %v3865_v27 = vld [vmem:[%s5225_s3 + $0x28] sm:$0xff] }
 0xd72   :  { %v2636_v31 = vpop.xlane.xlu0 %2635  ;;  %v2639_v33 = vpop.xlane.xlu1 %2638 }
 0xd73   :  { %4425 = vpow2.f32 %v2657_v29  ;;  %v2648_v34 = vsub.f32 %v2616_v61, %v2636_v31  ;;  %v2649_v35 = vsub.f32 %v2617_v60, %v2639_v33  ;;  %v4334_v29 = vpack.c.bf16 %v3865_v27, %v3864_v26 }
 0xd74   :  { %4427 = vpow2.f32 %v2659_v30  ;;  %v3867_v30 = vld [vmem:[%s5225_s3 + $0x38] sm:$0xff] }
 0xd75   :  { %v2661_v36 = vmul.f32 1.442695, %v2648_v34  ;;  %v2663_v37 = vmul.f32 1.442695, %v2649_v35 }
 0xd76   :  { %v2642_v38 = vpop.xlane.xlu0 %2641  ;;  %v2708_v39 = vpop.permute.xlu1 %2707 }
 0xd77   :  { %4429 = vpow2.f32 %v2661_v36  ;;  %v2650_v40 = vsub.f32 %v2618_v1, %v2642_v38  ;;  %4206 = vmatpush3.msra.mxu0 %v2708_v39 }
 0xd78   :  { %4431 = vpow2.f32 %v2663_v37  ;;  %4215 = vmatprep.subr.mxu0 %v4514_v10 }
 0xd79   :  { %v4424_v41 = vpop.eup %4423  ;;  %v2665_v42 = vmul.f32 1.442695, %v2650_v40 }
 0xd7a   :  { %v2784_v43 = vpop.permute.xlu0 %2783  ;;  %v2673_v44 = vsel %vm176_vm2, %v4424_v41, 0.0  ;;  %v2860_v53 = vpop.permute.xlu1 %2859 }
 0xd7b   :  { %4433 = vpow2.f32 %v2665_v42  ;;  %2674 = vadd.xlane.f32.xlu1 %v2673_v44  ;;  %4211 = vmatpush3.msra.mxu1 %v2784_v43 }
 0xd7c   :  { %4220 = vmatprep.subr.mxu1 %v4514_v10 }
 0xd7d   :  { %v4426_v45 = vpop.eup %4425 }
 0xd7e   :  { %v4428_v46 = vpop.eup %4427  ;;  %v2676_v47 = vsel %vm176_vm2, %v4426_v45, 0.0  ;;  %v2936_v54 = vpop.permute.xlu1 %2935 }
 0xd7f   :  { %2677 = vadd.xlane.f32.xlu0 %v2676_v47  ;;  %v2679_v48 = vsel %vm176_vm2, %v4428_v46, 0.0  ;;  %v3012_v55 = vpop.permute.xlu0 %3011 }
 0xd80   :  { %2680 = vadd.xlane.f32.xlu1 %v2679_v48 }
 0xd81   :  { %v4430_v49 = vpop.eup %4429 }
 0xd82   :  { %v4432_v50 = vpop.eup %4431  ;;  %v2682_v51 = vsel %vm176_vm2, %v4430_v49, 0.0  ;;  %v3088_v56 = vpop.permute.xlu1 %3087 }
 0xd83   :  { %2683 = vadd.xlane.f32.xlu0 %v2682_v51  ;;  %v2685_v18 = vsel %vm176_vm2, %v4432_v50, 0.0 }
 0xd84   :  { %2686 = vadd.xlane.f32.xlu1 %v2685_v18 }
 0xd85   :  { %v5063_v19 = vpop.eup %4433 }
 0xd86   :  { %v2688_v52 = vsel %vm176_vm2, %v5063_v19, 0.0 }
 0xd87   :  { %2689 = vadd.xlane.f32.xlu0 %v2688_v52 }
 0xd95   :  { %3239 = vrot.lane.b32.xlu1 %v4980_v32, %s4520_s17 }
 0xd9d   :  { %3163 = vrot.lane.b32.xlu0 %v4964_v28, %s4520_s17 }
 0xdaf   :  { %v2672_v57 = vpop.xlane.xlu0 %2671 }
 0xdb0   :  { %4435 = vrcp.f32 %v2672_v57 }
 0xdb3   :  { %v2669_v58 = vpop.xlane.xlu1 %2668 }
 0xdb4   :  { %4437 = vrcp.f32 %v2669_v58 }
 0xdba   :  { %v4436_v59 = vpop.eup %4435 }
 0xdbb   :  { %v2700_v60 = vmul.f32 %v4436_v59, %v5048_v13 }
 0xdbd   :  { %4213 = vmatmul.mubr.msk.f32.vlgmr.msra.gmra.mrb[34].mxu1 %vm176_vm2, %v2700_v60 }
 0xdbe   :  { %v4438_v61 = vpop.eup %4437  ;;  %4221 = vmatpush3.msra.mxu1 %v2936_v54  ;;  %4222 = vmatprep.mubr.msk.f32.mxu1 %vm4517_vm1, %v4514_v10 }
 0xdbf   :  { %v2699_v28 = vmul.f32 %v4438_v61, %v5052_v15  ;;  %4230 = vmatprep.subr.mxu1 %v4514_v10 }
 0xdc1   :  { %4208 = vmatmul.mubr.msk.f32.vlgmr.msra.gmra.mrb[24].mxu0 %vm176_vm2, %v2699_v28 }
 0xdc2   :  { %4216 = vmatpush3.msra.mxu0 %v2860_v53  ;;  %4217 = vmatprep.mubr.msk.f32.mxu0 %vm4517_vm1, %v4514_v10 }
 0xdc3   :  { %4225 = vmatprep.subr.mxu0 %v4514_v10 }
 0xe08   :  { %v2675_v32 = vpop.xlane.xlu1 %2674 }
 0xe09   :  { %4439 = vrcp.f32 %v2675_v32 }
 0xe0c   :  { %v2678_v7 = vpop.xlane.xlu0 %2677 }
 0xe0d   :  { %4441 = vrcp.f32 %v2678_v7  ;;  %v2681_v5 = vpop.xlane.xlu1 %2680 }
 0xe0e   :  { %4443 = vrcp.f32 %v2681_v5 }
 0xe10   :  { %v2684_v62 = vpop.xlane.xlu0 %2683 }
 0xe11   :  { %4445 = vrcp.f32 %v2684_v62  ;;  %v2687_v63 = vpop.xlane.xlu1 %2686 }
 0xe12   :  { %4447 = vrcp.f32 %v2687_v63 }
 0xe13   :  { %v4440_v0 = vpop.eup %4439 }
 0xe14   :  { %v2701_v1 = vmul.f32 %v4440_v0, %v4424_v41  ;;  %v2690_v2 = vpop.xlane.xlu0 %2689 }
 0xe15   :  { %4449 = vrcp.f32 %v2690_v2  ;;  %v3240_v15 = vpop.permute.xlu1 %3239 }
 0xe16   :  { %4218 = vmatmul.mubr.msk.f32.vlgmr.msra.gmra.mrb[26].mxu0 %vm176_vm2, %v2701_v1 }
 0xe17   :  { %v4442_v3 = vpop.eup %4441  ;;  %4226 = vmatpush3.msra.mxu0 %v3012_v55  ;;  %4227 = vmatprep.mubr.msk.f32.mxu0 %vm4517_vm1, %v4514_v10  ;;  %v3869_v55 = vld [vmem:[%s5226_s4 + $0x1] ss:$0 sm:$0xff] }
 0xe18   :  { %v4444_v4 = vpop.eup %4443  ;;  %v2702_v6 = vmul.f32 %v4442_v3, %v4426_v45  ;;  %4235 = vmatprep.subr.mxu0 %v4514_v10  ;;  %v3164_v9 = vpop.permute.xlu0 %3163 }
 0xe19   :  { %v2703_v8 = vmul.f32 %v4444_v4, %v4428_v46 }
 0xe1a   :  { %4223 = vmatmul.mubr.msk.f32.vlgmr.msra.gmra.mrb[36].mxu1 %vm176_vm2, %v2702_v6  ;;  %v3877_v6 = vld [vmem:[%s5229_s7 + $0x28] sm:$0xff] }
 0xe1b   :  { %v4446_v11 = vpop.eup %4445  ;;  %4228 = vmatmul.mubr.msk.f32.vlgmr.msra.gmra.mrb[28].mxu0 %vm176_vm2, %v2703_v8  ;;  %4231 = vmatpush3.msra.mxu1 %v3088_v56 }
 0xe1c   :  { %v4448_v12 = vpop.eup %4447  ;;  %v2704_v13 = vmul.f32 %v4446_v11, %v4430_v49  ;;  %4236 = vmatpush3.msra.mxu0 %v3164_v9  ;;  %4232 = vmatprep.mubr.msk.f32.mxu1 %vm4517_vm1, %v4514_v10  ;;  %v3878_v9 = vld [vmem:[%s5229_s7 + $0x30] sm:$0xff]  ;;  %v3879_v11 = vld [vmem:[%s5229_s7 + $0x38] sm:$0xff] }
 0xe1d   :  { %v2705_v14 = vmul.f32 %v4448_v12, %v4432_v50  ;;  %4237 = vmatprep.mubr.msk.f32.mxu0 %vm4517_vm1, %v4514_v10  ;;  %4240 = vmatprep.subr.mxu1 %v4514_v10  ;;  %v4346_v12 = vpack.c.bf16 %v3879_v11, %v3878_v9  ;;  %v3898_v9 = vld [vmem:[%s5233_s11 + $0x1] ss:$0 sm:$0xff] }
 0xe1e   :  { %4233 = vmatmul.mubr.msk.f32.vlgmr.msra.gmra.mrb[38].mxu1 %vm176_vm2, %v2704_v13  ;;  %4335 = vmatprep.subr.bf16.mxu0 %v4334_v29  ;;  %v3884_v13 = vld [vmem:[%s5231_s9 + $0x40] sm:$0xff] }
 0xe1f   :  { %v4450_v16 = vpop.eup %4449  ;;  %4238 = vmatmul.mubr.msk.f32.vlgmr.msra.gmra.mrb[30].mxu0 %vm176_vm2, %v2705_v14  ;;  %4241 = vmatpush3.msra.mxu1 %v3240_v15  ;;  %v3885_v14 = vld [vmem:[%s5231_s9 + $0x48] sm:$0xff]  ;;  %v3886_v15 = vld [vmem:[%s5231_s9 + $0x50] sm:$0xff] }
 0xe20   :  { %v2706_v21 = vmul.f32 %v4450_v16, %v5063_v19  ;;  %4242 = vmatprep.mubr.msk.f32.mxu1 %vm4517_vm1, %v4514_v10  ;;  %4337 = vmatpush3.bf16.msra.mxu0 %v4334_v29  ;;  %v3866_v10 = vld [vmem:[%s5225_s3 + $0x30] sm:$0xff]  ;;  %s5244_s3 = smov 24   ;;  %v4350_v16 = vpack.c.bf16 %v3885_v14, %v3884_v13  ;;  %v3899_v13 = vld [vmem:[%s5234_s12 + $0x1] ss:$0 sm:$0xff] }
 0xe21   :  { %v4338_v31 = vpack.c.bf16 %v3867_v30, %v3866_v10 }
 0xe22   :  { %4243 = vmatmul.mubr.msk.f32.vlgmr.msra.gmra.mrb[40].mxu1 %vm176_vm2, %v2706_v21  ;;  %v3887_v21 = vld [vmem:[%s5231_s9 + $0x58] sm:$0xff] }
 0xe23   :  { %4339 = vmatprep.subr.bf16.mxu0 %v4338_v31 }
 0xe24   :  { %4341 = vmatpush3.bf16.msra.mxu0 %v4338_v31 }
 0xe25   :  { %4351 = vmatprep.subr.bf16.mxu0 %v4350_v16 }
 0xe90   :  { %v2855_v22 = vpop.f32.mrb[34].mxu1 }
 0xe91   :  { %v4214_v23 = vpop.f32.mrb[35].mxu1 }
 0xe92   :  { %v3888_v23 = vld [vmem:[%s5231_s9 + $0x60] sm:$0xff] }
 0xe94   :  { %v2779_v24 = vpop.f32.mrb[24].mxu0 }
 0xe95   :  { %v4209_v25 = vpop.f32.mrb[25].mxu0 }
 0xee9   :  { %v2931_v33 = vpop.f32.mrb[26].mxu0 }
 0xeea   :  { %3317 = vrot.lane.b32.xlu0 %v2931_v33, %s4513_s29  ;;  %v4219_v34 = vpop.f32.mrb[27].mxu0 }
 0xeeb   :  { %v3874_v34 = vld [vmem:[%s5227_s5 + $0x1] ss:$0 sm:$0xff] }
 0xeed   :  { %v3007_v35 = vpop.f32.mrb[36].mxu1 }
 0xeee   :  { %v3083_v36 = vpop.f32.mrb[28].mxu0  ;;  %3319 = vrot.lane.b32.xlu1 %v3007_v35, %s4513_s29  ;;  %v4224_v37 = vpop.f32.mrb[37].mxu1 }
 0xeef   :  { %3325 = vrot.lane.b32.xlu0 %v3083_v36, %s5243_s21  ;;  %v4229_v38 = vpop.f32.mrb[29].mxu0  ;;  %v3875_v36 = vld [vmem:[%s5228_s6 + $0x1] ss:$0 sm:$0xff] }
 0xef1   :  { %v3159_v39 = vpop.f32.mrb[38].mxu1 }
 0xef2   :  { %v3235_v40 = vpop.f32.mrb[30].mxu0  ;;  %3327 = vrot.lane.b32.xlu1 %v3159_v39, %s5243_s21  ;;  %v4234_v41 = vpop.f32.mrb[39].mxu1  ;;  %s4485_s21 = scalar_lea.vmem %s3781_s28, 256 }
 0xef3   :  { %3333 = vrot.lane.b32.xlu0 %v3235_v40, %s5244_s3  ;;  %v4239_v42 = vpop.f32.mrb[31].mxu0  ;;  %p4486_p8 = scmp.ne.s32.totalorder %s3781_s28, %s4485_s21  ;;  %p4491_p10 = scmp.lt.s32.totalorder %s4485_s21, %s4485_s21 }
 0xef5   :  { %v3311_v43 = vpop.f32.mrb[40].mxu1  ;;  %p4492_p11 = por %p4491_p10, %p4490_p9 }
 0xef6   :  { %3335 = vrot.lane.b32.xlu1 %v3311_v43, %s5244_s3  ;;  %v4244_v44 = vpop.f32.mrb[41].mxu1  ;;  %v3890_v43 = vld [vmem:[%s5231_s9 + $0x70] sm:$0xff] }
 0xef7   :  { %v3891_v44 = vld [vmem:[%s5231_s9 + $0x78] sm:$0xff]  ;;  %p4493_p12 = pnand %p4492_p11, %p4486_p8 }
 0xf5c   :  { %v3318_v45 = vpop.permute.xlu0 %3317 }
 0xf5d   :  { %v3339_v48 = vsel %vm176_vm2, %v2779_v24, %v3318_v45  ;;  %v3889_v24 = vld [vmem:[%s5231_s9 + $0x68] sm:$0xff]  ;;  %v4362_v45 = vpack.c.bf16 %v3891_v44, %v3890_v43  ;;  %v3900_v43 = vld [vmem:[%s5235_s13] ss:$0 sm:$0xff] }
 0xf5e   :  { %v4358_v25 = vpack.c.bf16 %v3889_v24, %v3888_v23 }
 0xf60   :  { %v3320_v46 = vpop.permute.xlu1 %3319 }
 0xf61   :  { %v3326_v47 = vpop.permute.xlu0 %3325  ;;  %v3340_v19 = vsel %vm176_vm2, %v2855_v22, %v3320_v46  ;;  %v4354_v22 = vpack.c.bf16 %v3887_v21, %v3886_v15  ;;  %v3881_v46 = vld [vmem:[%s5230_s8 + $0x1] ss:$0 sm:$0xff] }
 0xf62   :  { %v3341_v50 = vsel %vm1513_vm3, %v3339_v48, %v3326_v47 }
 0xf64   :  { %v3328_v49 = vpop.permute.xlu1 %3327 }
 0xf65   :  { %v3334_v51 = vpop.permute.xlu0 %3333  ;;  %v3342_v52 = vsel %vm1513_vm3, %v3340_v19, %v3328_v49  ;;  %v3893_v19 = vld [vmem:[%s5232_s10 + $0x1] ss:$0 sm:$0xff] }
 0xf66   :  { %v3343_v18 = vsel %vm1516_vm4, %v3341_v50, %v3334_v51 }
 0xf67   :  { %4253 = vmatprep.mubr.msk.f32.mxu0 %vm78_vm0, %v3343_v18 }
 0xf68   :  { %v3336_v53 = vpop.permute.xlu1 %3335 }
 0xf69   :  { %v3344_v54 = vsel %vm1516_vm4, %v3342_v52, %v3336_v53 }
 0xf6a   :  { %4254 = vmatmul.mubr.msk.f32.vlgmr.msra.gmra.mrb[32].mxu0 %vm78_vm0, %v3344_v54 }
 0xf6b   :  { %4353 = vmatpush3.bf16.msra.mxu0 %v4350_v16 }
 0xf6c   :  { %4355 = vmatprep.subr.bf16.mxu0 %v4354_v22 }
 0xf6f   :  { %4357 = vmatpush3.bf16.msra.mxu0 %v4354_v22 }
 0xf70   :  { %4359 = vmatprep.subr.bf16.mxu0 %v4358_v25 }
 0xf73   :  { %4361 = vmatpush3.bf16.msra.mxu0 %v4358_v25 }
 0xf74   :  { %4363 = vmatprep.subr.bf16.mxu0 %v4362_v45 }
 0xf77   :  { %4365 = vmatpush3.bf16.msra.mxu0 %v4362_v45 }
0x103d   :  { %v4255_v56 = vpop.f32.mrb[32].mxu0 }
0x103e   :  { %v3436_v57 = vadd.f32 %v4255_v56, %v3869_v55  ;;  %v3430_v58 = vpop.f32.mrb[33].mxu0 }
0x103f   :  { %v3431_v59 = vadd.f32 %v3869_v55, %v3430_v58 }
0x1040   :  { %v3440_v60 = vadd.f32 %v3436_v57, %v4925_v20 }
0x1041   :  { %v3439_v61 = vadd.f32 %v3431_v59, %v4923_v17  ;;  %v3876_v17 = vld [vmem:[%s5229_s7 + $0x20] sm:$0xff] }
0x1042   :  { %v3448_v28 = vsel %vm78_vm0, %v3440_v60, 0.0  ;;  %v4342_v8 = vpack.c.bf16 %v3877_v6, %v3876_v17 }
0x1043   :  { %3449 = vadd.xlane.f32.xlu1 %v3448_v28  ;;  %v3445_v32 = vsel %vm78_vm0, %v3439_v61, 0.0 }
0x1044   :  { %3446 = vadd.xlane.f32.xlu0 %v3445_v32  ;;  %4343 = vmatprep.subr.bf16.mxu1 %v4342_v8 }
0x1045   :  { %4345 = vmatpush3.bf16.msra.mxu1 %v4342_v8 }
0x1046   :  { %4347 = vmatprep.subr.bf16.mxu1 %v4346_v12 }
0x1049   :  { %4349 = vmatpush3.bf16.msra.mxu1 %v4346_v12 }
0x10d0   :  { %v3450_v7 = vpop.xlane.xlu1 %3449 }
0x10d1   :  { %v3452_v5 = vmul.f32 0.03125, %v3450_v7  ;;  %v3447_v62 = vpop.xlane.xlu0 %3446 }
0x10d2   :  { %v3451_v63 = vmul.f32 0.03125, %v3447_v62 }
0x10d3   :  { %v3454_v0 = vsub.f32 %v3440_v60, %v3452_v5 }
0x10d4   :  { %v3453_v1 = vsub.f32 %v3439_v61, %v3451_v63 }
0x10d5   :  { %v3456_v4 = vmul.f32 %v3454_v0, %v3454_v0 }
0x10d6   :  { %v3455_v2 = vmul.f32 %v3453_v1, %v3453_v1 }
0x10d7   :  { %v3460_v20 = vsel %vm78_vm0, %v3456_v4, 0.0 }
0x10d8   :  { %v3457_v3 = vsel %vm78_vm0, %v3455_v2, 0.0 }
0x10d9   :  { %3458 = vadd.xlane.f32.xlu0 %v3457_v3 }
0x10dd   :  { %3461 = vadd.xlane.f32.xlu0 %v3460_v20 }
0x1166   :  { %v3459_v26 = vpop.xlane.xlu0 %3458 }
0x1167   :  { %v3463_v27 = vmul.f32 0.03125, %v3459_v26 }
0x1169   :  { %v3465_v29 = vadd.f32 1e-05, %v3463_v27 }
0x116a   :  { %v3462_v10 = vpop.xlane.xlu0 %3461 }
0x116b   :  { %4451 = vrsqrt.f32 %v3465_v29  ;;  %v3464_v30 = vmul.f32 0.03125, %v3462_v10 }
0x116d   :  { %v3466_v31 = vadd.f32 1e-05, %v3464_v30 }
0x116f   :  { %4453 = vrsqrt.f32 %v3466_v31 }
0x1175   :  { %v4452_v33 = vpop.eup %4451 }
0x1176   :  { %v3469_v35 = vmul.f32 %v4452_v33, %v3453_v1 }
0x1178   :  { %v3477_v37 = vmul.f32 %v3874_v34, %v3469_v35 }
0x1179   :  { %v4454_v38 = vpop.eup %4453 }
0x117a   :  { %v3470_v39 = vmul.f32 %v4454_v38, %v3454_v0  ;;  %v3485_v40 = vadd.f32 %v3875_v36, %v3477_v37 }
0x117c   :  { %v3478_v41 = vmul.f32 %v3874_v34, %v3470_v39  ;;  %4264 = vmatprep.mubr.msk.f32.mxu1 %vm78_vm0, %v3485_v40 }
0x117e   :  { %v3486_v42 = vadd.f32 %v3875_v36, %v3478_v41 }
0x1180   :  { %4265 = vmatmul.mubr.msk.f32.vlgmr.msra.gmra.mrb[42].mxu1 %vm78_vm0, %v3486_v42 }
0x1253   :  { %v4266_v47 = vpop.f32.mrb[42].mxu1 }
0x1254   :  { %v3578_v48 = vadd.f32 %v4266_v47, %v3881_v46  ;;  %v3572_v49 = vpop.f32.mrb[43].mxu1  ;;  %v3901_v47 = vld [vmem:[%s5236_s14] ss:$0 sm:$0xff] }
0x1255   :  { %v3573_v50 = vadd.f32 %v3881_v46, %v3572_v49 }
0x1256   :  { %v3582_v18 = vmax.f32 %v3578_v48, 0.0 }
0x1257   :  { %v3581_v51 = vmax.f32 %v3573_v50, 0.0 }
0x1259   :  { %4283 = vmatprep.mubr.msk.f32.mxu0 %vm1767_vm5, %v3581_v51 }
0x125a   :  { %4284 = vmatmul.mubr.msk.f32.vlgmr.msra.gmra.mrb[34].mxu0 %vm1767_vm5, %v3582_v18 }
0x132d   :  { %v4285_v52 = vpop.f32.mrb[34].mxu0 }
0x132e   :  { %v3678_v53 = vadd.f32 %v4285_v52, %v3893_v19  ;;  %v3672_v54 = vpop.f32.mrb[35].mxu0 }
0x132f   :  { %v3673_v55 = vadd.f32 %v3893_v19, %v3672_v54 }
0x1330   :  { %v3682_v56 = vadd.f32 %v3678_v53, %v3486_v42 }
0x1331   :  { %v3681_v57 = vadd.f32 %v3673_v55, %v3485_v40 }
0x1332   :  { %v3690_v58 = vsel %vm78_vm0, %v3682_v56, 0.0 }
0x1333   :  { %3691 = vadd.xlane.f32.xlu0 %v3690_v58  ;;  %v3687_v59 = vsel %vm78_vm0, %v3681_v57, 0.0 }
0x1334   :  { %3688 = vadd.xlane.f32.xlu1 %v3687_v59 }
0x13c0   :  { %v3692_v60 = vpop.xlane.xlu0 %3691 }
0x13c1   :  { %v3694_v61 = vmul.f32 0.03125, %v3692_v60  ;;  %v3689_v28 = vpop.xlane.xlu1 %3688 }
0x13c2   :  { %v3693_v32 = vmul.f32 0.03125, %v3689_v28 }
0x13c3   :  { %v3696_v7 = vsub.f32 %v3682_v56, %v3694_v61 }
0x13c4   :  { %v3695_v5 = vsub.f32 %v3681_v57, %v3693_v32 }
0x13c5   :  { %v3698_v62 = vmul.f32 %v3696_v7, %v3696_v7 }
0x13c6   :  { %v3697_v63 = vmul.f32 %v3695_v5, %v3695_v5 }
0x13c7   :  { %v3702_v0 = vsel %vm78_vm0, %v3698_v62, 0.0 }
0x13c8   :  { %3703 = vadd.xlane.f32.xlu0 %v3702_v0  ;;  %v3699_v1 = vsel %vm78_vm0, %v3697_v63, 0.0 }
0x13c9   :  { %3700 = vadd.xlane.f32.xlu1 %v3699_v1 }
0x1455   :  { %v3704_v2 = vpop.xlane.xlu0 %3703 }
0x1456   :  { %v3706_v3 = vmul.f32 0.03125, %v3704_v2  ;;  %v3701_v4 = vpop.xlane.xlu1 %3700 }
0x1457   :  { %v3705_v20 = vmul.f32 0.03125, %v3701_v4 }
0x1458   :  { %v3708_v17 = vadd.f32 1e-05, %v3706_v3 }
0x1459   :  { %v3707_v6 = vadd.f32 1e-05, %v3705_v20 }
0x145a   :  { %4455 = vrsqrt.f32 %v3708_v17 }
0x145b   :  { %4457 = vrsqrt.f32 %v3707_v6 }
0x1464   :  { %v4456_v8 = vpop.eup %4455 }
0x1465   :  { %v4458_v11 = vpop.eup %4457  ;;  %v3712_v12 = vmul.f32 %v4456_v8, %v3696_v7 }
0x1466   :  { %v3711_v14 = vmul.f32 %v4458_v11, %v3695_v5 }
0x1467   :  { %v3720_v15 = vmul.f32 %v3898_v9, %v3712_v12 }
0x1468   :  { %v3719_v16 = vmul.f32 %v3898_v9, %v3711_v14 }
0x1469   :  { %v3728_v21 = vadd.f32 %v3899_v13, %v3720_v15 }
0x146a   :  { %v3727_v22 = vadd.f32 %v3899_v13, %v3719_v16 }
0x146b   :  { %v3734_v23 = vsel %vm78_vm0, %v3728_v21, 0.0 }
0x146c   :  { %3735 = vadd.xlane.f32.xlu0 %v3734_v23  ;;  %v3731_v24 = vsel %vm78_vm0, %v3727_v22, 0.0 }
0x146d   :  { %3732 = vadd.xlane.f32.xlu1 %v3731_v24 }
0x14f9   :  { %v3736_v25 = vpop.xlane.xlu0 %3735 }
0x14fa   :  { %v3738_v26 = vmul.f32 0.03125, %v3736_v25  ;;  %v3733_v27 = vpop.xlane.xlu1 %3732 }
0x14fb   :  { %v3737_v29 = vmul.f32 0.03125, %v3733_v27 }
0x14fc   :  { %v3740_v10 = vsub.f32 %v3728_v21, %v3738_v26 }
0x14fd   :  { %v3739_v30 = vsub.f32 %v3727_v22, %v3737_v29 }
0x14fe   :  { %v3742_v31 = vmul.f32 %v3740_v10, %v3740_v10 }
0x14ff   :  { %v3741_v33 = vmul.f32 %v3739_v30, %v3739_v30 }
0x1500   :  { %v3746_v34 = vsel %vm78_vm0, %v3742_v31, 0.0 }
0x1501   :  { %3747 = vadd.xlane.f32.xlu0 %v3746_v34  ;;  %v3743_v35 = vsel %vm78_vm0, %v3741_v33, 0.0 }
0x1502   :  { %3744 = vadd.xlane.f32.xlu1 %v3743_v35 }
0x158e   :  { %v3748_v36 = vpop.xlane.xlu0 %3747 }
0x158f   :  { %v3750_v37 = vmul.f32 0.03125, %v3748_v36  ;;  %v3745_v38 = vpop.xlane.xlu1 %3744 }
0x1590   :  { %v3749_v39 = vmul.f32 0.03125, %v3745_v38 }
0x1591   :  { %v3752_v40 = vadd.f32 1e-05, %v3750_v37 }
0x1592   :  { %v3751_v41 = vadd.f32 1e-05, %v3749_v39 }
0x1593   :  { %4459 = vrsqrt.f32 %v3752_v40 }
0x1594   :  { %4461 = vrsqrt.f32 %v3751_v41 }
0x159d   :  { %v4460_v42 = vpop.eup %4459 }
0x159e   :  { %v4462_v44 = vpop.eup %4461  ;;  %v3756_v45 = vmul.f32 %v4460_v42, %v3740_v10 }
0x159f   :  { %v3755_v46 = vmul.f32 %v4462_v44, %v3739_v30 }
0x15a0   :  { %v3764_v48 = vmul.f32 %v3900_v43, %v3756_v45 }
0x15a1   :  { %v3763_v49 = vmul.f32 %v3900_v43, %v3755_v46 }
0x15a2   :  { %v3772_v50 = vadd.f32 %v3901_v47, %v3764_v48 }
0x15a3   :  { %v3771_v51 = vadd.f32 %v3901_v47, %v3763_v49 }
0x15a4   :  { %3774 = vst.msk [vmem:[#allocation5 + $0x8] sm:$0xff] %vm78_vm0, %v3772_v50 }
0x15a5   :  { %3773 = vst.msk [vmem:[#allocation5] sm:$0xff] %vm78_vm0, %v3771_v51 }
0x15a6   :  { %4496 = shalt.err (!%p4493_p12)
}
0x15a7   :  { %s4497_s7 = scalar_lea.hbm %s5237_s15, 256 }
0x15a8   :  { %p4498_p13 = scmp.ne.s32.totalorder %s5237_s15, %s4497_s7  ;;  %p4501_p0 = scmp.lt.u32.totalorder %s4497_s7, %s5237_s15 }
0x15aa   :  { %p4503_p1 = pnand %p4501_p0, %p4498_p13 }
0x15ac   :  { %4506 = shalt.err (!%p4503_p1)
}
0x15ad   :  { %s5245_s19 = smov 128  }
0x15ae   :  { %3786 = dma.vmem_to_hbm [thread:$0]  %s3781_s28, 256, %s5237_s15, [#allocation4], %s5245_s19, %s5245_s19, %s4513_s29  }
0x15af   :  { %4509 = dma.done.wait [#allocation4], 256  }
0x15b0   :  { %4510 = vsyncadd [#allocation4], 4294967040 }
0x15b1   :  { %3790 = vsyncpa [#allocation3], 1 }
0x15b2   :  { %3791 = vsyncpa [#allocation4], 1 }

</bundles_post_ra>
